<compile_context>
chip_gen: v5e
topology: v5e:2x2
jax: 0.10.0
libtpu: 0.0.40
codegen_flags: <defaults>
</compile_context>

<pallas_src>
import functools
import math

import jax
import jax.numpy as jnp
from jax import lax
from jax.experimental import pallas as pl
from jax.experimental.pallas import tpu as pltpu


def _round_up(x, m):
    return ((x + m - 1) // m) * m


# --------------------------- fused LSTM + FC kernel ---------------------------
def _make_lstm_fc_kernel(num_layers, T, B_pad, H_pad):
    """Ref order: x, (w_ih_t, w_hh_t, bias) * L, fc_w_t, fc_b, out, seq_scr, xw_scr.

      x        : (T*B_pad, I)        bf16, time-major flattened input
      w_ih_t   : (in_sz, 4*H_pad)    bf16, pre-transposed, gate order [i|f|o|g]
      w_hh_t   : (H_pad, 4*H_pad)    bf16, pre-transposed, gate order [i|f|o|g]
      bias     : (1, 4*H_pad)        f32, b_ih + b_hh (zero in padded lanes)
      fc_w_t   : (H_pad, O_pad)      bf16, pre-transposed
      fc_b     : (1, O_pad)          f32
      out      : (B_pad, O_pad)      f32
      seq_scr  : (T*B_pad, H_pad)    bf16 scratch, inter-layer activations
      xw_scr   : (T*B_pad, 4*H_pad)  f32 scratch, hoisted input projection
    """

    def kernel(*refs):
        x_ref = refs[0]
        layer_refs = refs[1:1 + 3 * num_layers]
        fc_w_ref = refs[1 + 3 * num_layers]
        fc_b_ref = refs[2 + 3 * num_layers]
        out_ref = refs[3 + 3 * num_layers]
        seq_scr = refs[4 + 3 * num_layers]
        xw_scr = refs[5 + 3 * num_layers]

        h = jnp.zeros((B_pad, H_pad), jnp.float32)
        for layer in range(num_layers):                    # static unroll over layers
            w_ih = layer_refs[3 * layer][...]              # (in_sz, 4*H_pad) bf16
            w_hh = layer_refs[3 * layer + 1][...]          # (H_pad, 4*H_pad) bf16
            bias = layer_refs[3 * layer + 2][...]          # (1, 4*H_pad) f32

            # Input to this layer: raw x for layer 0, previous layer's hidden
            # sequence (kept in VMEM scratch) otherwise.  Both are bf16.
            xin = x_ref[...] if layer == 0 else seq_scr[...]

            # Hoisted input projection: one MXU GEMM per layer over the whole
            # sequence, bias folded in, result parked in VMEM scratch.
            xw_scr[...] = (
                jnp.dot(xin, w_ih, preferred_element_type=jnp.float32) + bias)

            write_seq = layer < num_layers - 1             # last layer: only h needed

            def step(t, carry):
                h, c = carry
                row = pl.multiple_of(t * B_pad, B_pad)     # sublane-aligned slice
                gates = xw_scr[pl.ds(row, B_pad), :] + jnp.dot(
                    h.astype(jnp.bfloat16), w_hh,
                    preferred_element_type=jnp.float32)    # (B_pad, 4*H_pad) f32
                # Gate column order is [i | f | o | g]: one sigmoid over 3*H_pad,
                # one tanh over H_pad; all slices are 128-lane aligned.
                sig = jax.nn.sigmoid(gates[:, :3 * H_pad])
                i_g = sig[:, 0 * H_pad:1 * H_pad]
                f_g = sig[:, 1 * H_pad:2 * H_pad]
                o_g = sig[:, 2 * H_pad:3 * H_pad]
                g_g = jnp.tanh(gates[:, 3 * H_pad:4 * H_pad])
                c = f_g * c + i_g * g_g
                h = o_g * jnp.tanh(c)
                if write_seq:
                    seq_scr[pl.ds(row, B_pad), :] = h.astype(jnp.bfloat16)
                return h, c

            h, _ = lax.fori_loop(
                0, T, step,
                (jnp.zeros((B_pad, H_pad), jnp.float32),
                 jnp.zeros((B_pad, H_pad), jnp.float32)))

        # Fused FC head on the last layer's final hidden state (lane-dense store).
        out_ref[...] = (
            jnp.dot(h.astype(jnp.bfloat16), fc_w_ref[...],
                    preferred_element_type=jnp.float32)
            + fc_b_ref[...]).astype(out_ref.dtype)

    return kernel


def _lstm_fc_pallas(x2d, lstm_params, fc_w_t, fc_b, T, B_pad, H_pad):
    """x2d: (T*B_pad, I) bf16 time-major flattened input. Returns (B_pad, O_pad) f32."""
    O_pad = fc_w_t.shape[1]
    num_layers = len(lstm_params)

    flat = []
    for (w_ih_t, w_hh_t, b) in lstm_params:
        flat.extend([w_ih_t, w_hh_t, b])
    n_inputs = 1 + len(flat) + 2

    # Explicit VMEM budget: everything is resident (inputs + scratches + output).
    def _nbytes(a):
        return int(a.size) * jnp.dtype(a.dtype).itemsize
    resident = _nbytes(x2d) + sum(_nbytes(a) for a in flat)
    resident += _nbytes(fc_w_t) + _nbytes(fc_b)
    resident += B_pad * O_pad * 4                       # output
    resident += T * B_pad * H_pad * 2                   # seq_scr (bf16)
    resident += T * B_pad * 4 * H_pad * 4               # xw_scr (f32)
    vmem_limit = int(min(64 * 1024 * 1024, max(16 * 1024 * 1024, 2 * resident)))

    kernel = _make_lstm_fc_kernel(num_layers, T, B_pad, H_pad)
    return pl.pallas_call(
        kernel,
        out_shape=jax.ShapeDtypeStruct((B_pad, O_pad), jnp.float32),
        in_specs=[pl.BlockSpec(memory_space=pltpu.MemorySpace.VMEM)] * n_inputs,
        out_specs=pl.BlockSpec(memory_space=pltpu.MemorySpace.VMEM),
        scratch_shapes=[pltpu.VMEM((T * B_pad, H_pad), jnp.bfloat16),
                        pltpu.VMEM((T * B_pad, 4 * H_pad), jnp.float32)],
        compiler_params=pltpu.CompilerParams(vmem_limit_bytes=vmem_limit),
    )(x2d, *flat, fc_w_t, fc_b)


# -------------------------------- full forward --------------------------------
@functools.partial(jax.jit, static_argnames=("pred_len", "output_size"))
def lstm_model_forward(x_bti, kparams, pred_len, output_size):
    """x_bti: (B, T, input_size), batch_first like the PyTorch module."""
    B, T, I = x_bti.shape
    B_pad = _round_up(B, 8)
    H_pad = kparams["lstm"][0][1].shape[0]     # w_hh_t: (H_pad, 4*H_pad)

    # Time-major, batch padded to a sublane multiple, cast bf16 for the MXU.
    x_tbi = jnp.transpose(x_bti, (1, 0, 2))
    x_tbi = jnp.pad(x_tbi, ((0, 0), (0, B_pad - B), (0, 0)))
    x2d = x_tbi.reshape(T * B_pad, I).astype(jnp.bfloat16)

    out_pad = _lstm_fc_pallas(x2d, kparams["lstm"], kparams["fc_w_t"],
                              kparams["fc_b"], T, B_pad, H_pad)
    out = out_pad[:B, :output_size]
    # unsqueeze(1).repeat(1, pred_len, 1)
    return jnp.broadcast_to(out[:, None, :], (B, pred_len, output_size))


# --------------------------------- param init ---------------------------------
def init_raw_params(key, input_size, hidden_size, num_layers, output_size):
    """PyTorch-layout parameters (for the reference and for kernel-param prep)."""
    bound = 1.0 / math.sqrt(hidden_size)
    lstm = []
    for layer in range(num_layers):
        in_sz = input_size if layer == 0 else hidden_size
        key, k1, k2, k3, k4 = jax.random.split(key, 5)
        w_ih = jax.random.uniform(k1, (4 * hidden_size, in_sz), jnp.float32, -bound, bound)
        w_hh = jax.random.uniform(k2, (4 * hidden_size, hidden_size), jnp.float32, -bound, bound)
        b_ih = jax.random.uniform(k3, (4 * hidden_size,), jnp.float32, -bound, bound)
        b_hh = jax.random.uniform(k4, (4 * hidden_size,), jnp.float32, -bound, bound)
        lstm.append((w_ih, w_hh, b_ih, b_hh))
    key, k5, k6 = jax.random.split(key, 3)
    fc_w = jax.random.uniform(k5, (output_size, hidden_size), jnp.float32, -bound, bound)
    fc_b = jax.random.uniform(k6, (output_size,), jnp.float32, -bound, bound)
    return {"lstm": lstm, "fc_w": fc_w, "fc_b": fc_b}


def prepare_kernel_params(raw, hidden_size, output_size):
    """Pre-transpose, reorder gates [i|f|o|g], zero-pad H/O to 128 lanes, cast bf16."""
    H = hidden_size
    H_pad = _round_up(H, 128)
    O_pad = _round_up(output_size, 128)
    # PyTorch gate row order [i, f, g, o] -> kernel order [i, f, o, g].
    perm = jnp.concatenate([jnp.arange(0, H), jnp.arange(H, 2 * H),
                            jnp.arange(3 * H, 4 * H), jnp.arange(2 * H, 3 * H)])

    def pad_gate_cols(w_t, dtype):
        # w_t: (rows, 4*H), gate-reordered -> (rows, 4*H_pad), zero in padded lanes.
        rows = w_t.shape[0]
        out = jnp.zeros((rows, 4 * H_pad), dtype)
        for k in range(4):
            out = out.at[:, k * H_pad:k * H_pad + H].set(
                w_t[:, k * H:(k + 1) * H].astype(dtype))
        return out

    lstm = []
    for layer, (w_ih, w_hh, b_ih, b_hh) in enumerate(raw["lstm"]):
        w_ih_t = w_ih[perm].T                      # (in_sz, 4H)
        w_hh_t = w_hh[perm].T                      # (H, 4H)
        bias = (b_ih + b_hh)[perm][None, :]        # (1, 4H)
        w_ih_tp = pad_gate_cols(w_ih_t, jnp.bfloat16)
        if layer > 0:                              # contraction dim is padded H
            w_ih_tp = jnp.pad(w_ih_tp, ((0, H_pad - H), (0, 0)))
        w_hh_tp = jnp.pad(pad_gate_cols(w_hh_t, jnp.bfloat16), ((0, H_pad - H), (0, 0)))
        bias_p = pad_gate_cols(bias, jnp.float32)
        lstm.append((w_ih_tp, w_hh_tp, bias_p))

    fc_w_t = jnp.zeros((H_pad, O_pad), jnp.bfloat16)
    fc_w_t = fc_w_t.at[:H, :output_size].set(raw["fc_w"].T.astype(jnp.bfloat16))
    fc_b = jnp.zeros((1, O_pad), jnp.float32).at[0, :output_size].set(raw["fc_b"])
    return {"lstm": lstm, "fc_w_t": fc_w_t, "fc_b": fc_b}


# ----------------------------- pure-JAX reference ------------------------------
def reference_forward(x_bti, raw, pred_len):
    B, T, _ = x_bti.shape
    seq = x_bti
    for (w_ih, w_hh, b_ih, b_hh) in raw["lstm"]:
        H = w_hh.shape[1]
        h = jnp.zeros((B, H), jnp.float32)
        c = jnp.zeros((B, H), jnp.float32)
        outs = []
        for t in range(T):
            g = seq[:, t, :] @ w_ih.T + h @ w_hh.T + b_ih + b_hh
            i = jax.nn.sigmoid(g[:, 0 * H:1 * H])
            f = jax.nn.sigmoid(g[:, 1 * H:2 * H])
            gg = jnp.tanh(g[:, 2 * H:3 * H])
            o = jax.nn.sigmoid(g[:, 3 * H:4 * H])
            c = f * c + i * gg
            h = o * jnp.tanh(c)
            outs.append(h)
        seq = jnp.stack(outs, axis=1)
    out = seq[:, -1, :] @ raw["fc_w"].T + raw["fc_b"]
    return jnp.broadcast_to(out[:, None, :], (B, pred_len, out.shape[-1]))


if __name__ == "__main__":
    # Small shapes consistent with the module's forward.
    batch, seq_len = 2, 8
    input_size, hidden_size, num_layers = 4, 32, 2
    output_size, pred_len = 4, 3

    key = jax.random.PRNGKey(0)
    key, kx, kp = jax.random.split(key, 3)
    x = jax.random.normal(kx, (batch, seq_len, input_size), jnp.float32)
    raw = init_raw_params(kp, input_size, hidden_size, num_layers, output_size)
    kparams = prepare_kernel_params(raw, hidden_size, output_size)

    out = lstm_model_forward(x, kparams, pred_len=pred_len, output_size=output_size)
    out = jax.block_until_ready(out)

    ref = reference_forward(x, raw, pred_len)
    assert out.shape == (batch, pred_len, output_size)
    # Kernel matmuls run in bf16 (f32 accumulate) vs the pure-f32 reference.
    assert jnp.allclose(out, ref, atol=2e-2, rtol=2e-2), float(jnp.max(jnp.abs(out - ref)))

    print("KERNEL_OK")
</pallas_src>

<mosaic_0001>
module attributes {stable_mosaic.version = 11 : i64} {
  func.func @kernel(%arg0: memref<64x4xbf16, #tpu.memory_space<vmem>>, %arg1: memref<4x512xbf16, #tpu.memory_space<vmem>>, %arg2: memref<128x512xbf16, #tpu.memory_space<vmem>>, %arg3: memref<1x512xf32, #tpu.memory_space<vmem>>, %arg4: memref<128x512xbf16, #tpu.memory_space<vmem>>, %arg5: memref<128x512xbf16, #tpu.memory_space<vmem>>, %arg6: memref<1x512xf32, #tpu.memory_space<vmem>>, %arg7: memref<128x128xbf16, #tpu.memory_space<vmem>>, %arg8: memref<1x128xf32, #tpu.memory_space<vmem>>, %arg9: memref<8x128xf32, #tpu.memory_space<vmem>>, %arg10: memref<64x128xbf16, #tpu.memory_space<vmem>>, %arg11: memref<64x512xf32, #tpu.memory_space<vmem>>) attributes {dimension_semantics = [], scalar_prefetch = 0 : i64, scratch_operands = 2 : i64, tpu.core_type = #tpu.core_type<tc>} {
    %c0 = arith.constant 0 : index
    %c0_0 = arith.constant 0 : index
    %0 = vector.load %arg1[%c0, %c0_0] : memref<4x512xbf16, #tpu.memory_space<vmem>>, vector<4x512xbf16>
    %c0_1 = arith.constant 0 : index
    %c0_2 = arith.constant 0 : index
    %1 = vector.load %arg2[%c0_1, %c0_2] : memref<128x512xbf16, #tpu.memory_space<vmem>>, vector<128x512xbf16>
    %c0_3 = arith.constant 0 : index
    %c0_4 = arith.constant 0 : index
    %2 = vector.load %arg3[%c0_3, %c0_4] : memref<1x512xf32, #tpu.memory_space<vmem>>, vector<1x512xf32>
    %c0_5 = arith.constant 0 : index
    %c0_6 = arith.constant 0 : index
    %3 = vector.load %arg0[%c0_5, %c0_6] : memref<64x4xbf16, #tpu.memory_space<vmem>>, vector<64x4xbf16>
    %cst = arith.constant dense<0.000000e+00> : vector<64x512xf32>
    %4 = tpu.matmul %3, %0, %cst {dimension_numbers = #tpu.dot_dimension_numbers<[1], [0], [0], [1], [0, 0, 1, 1], [], []>} : vector<64x4xbf16>, vector<4x512xbf16>, vector<64x512xf32> -> vector<64x512xf32>
    %5 = vector.broadcast %2 : vector<1x512xf32> to vector<64x512xf32>
    %6 = arith.addf %4, %5 : vector<64x512xf32>
    %c0_7 = arith.constant 0 : index
    %c0_8 = arith.constant 0 : index
    %7 = vector.load %arg11[%c0_7, %c0_8] : memref<64x512xf32, #tpu.memory_space<vmem>>, vector<64x512xf32>
    tpu.vector_store %arg11[%c0_7, %c0_8], %6 {strides = array<i32>} : memref<64x512xf32, #tpu.memory_space<vmem>>, vector<64x512xf32>,
    %cst_9 = arith.constant 0.000000e+00 : f32
    %8 = vector.broadcast %cst_9 : f32 to vector<8x128xf32>
    %cst_10 = arith.constant 0.000000e+00 : f32
    %9 = vector.broadcast %cst_10 : f32 to vector<8x128xf32>
    %c0_i32 = arith.constant 0 : i32
    %c8_i32 = arith.constant 8 : i32
    %10 = arith.addi %c0_i32, %c8_i32 : i32
    %c1_i32 = arith.constant 1 : i32
    %11:2 = scf.for %arg12 = %c0_i32 to %10 step %c1_i32 iter_args(%arg13 = %8, %arg14 = %9) -> (vector<8x128xf32>, vector<8x128xf32>)  : i32 {
      %c8_i32_36 = arith.constant 8 : i32
      %31 = arith.muli %arg12, %c8_i32_36 : i32
      %32 = tpu.assume_multiple %31, 8 : i32
      %33 = arith.index_cast %32 : i32 to index
      %c0_37 = arith.constant 0 : index
      %34 = vector.load %arg11[%33, %c0_37] : memref<64x512xf32, #tpu.memory_space<vmem>>, vector<8x512xf32>
      %35 = arith.truncf %arg13 : vector<8x128xf32> to vector<8x128xbf16>
      %cst_38 = arith.constant dense<0.000000e+00> : vector<8x512xf32>
      %36 = tpu.matmul %35, %1, %cst_38 {dimension_numbers = #tpu.dot_dimension_numbers<[1], [0], [0], [1], [0, 0, 1, 1], [], []>} : vector<8x128xbf16>, vector<128x512xbf16>, vector<8x512xf32> -> vector<8x512xf32>
      %37 = arith.addf %34, %36 : vector<8x512xf32>
      %38 = vector.extract_strided_slice %37 {offsets = [0, 0], sizes = [8, 384], strides = [1, 1]} : vector<8x512xf32> to vector<8x384xf32>
      %39 = arith.negf %38 : vector<8x384xf32>
      %40 = math.exp %39 : vector<8x384xf32>
      %cst_39 = arith.constant 1.000000e+00 : f32
      %41 = vector.broadcast %cst_39 : f32 to vector<8x384xf32>
      %42 = arith.addf %41, %40 : vector<8x384xf32>
      %43 = arith.divf %41, %42 : vector<8x384xf32>
      %44 = vector.extract_strided_slice %43 {offsets = [0, 0], sizes = [8, 128], strides = [1, 1]} : vector<8x384xf32> to vector<8x128xf32>
      %45 = vector.extract_strided_slice %43 {offsets = [0, 128], sizes = [8, 128], strides = [1, 1]} : vector<8x384xf32> to vector<8x128xf32>
      %46 = vector.extract_strided_slice %43 {offsets = [0, 256], sizes = [8, 128], strides = [1, 1]} : vector<8x384xf32> to vector<8x128xf32>
      %47 = vector.extract_strided_slice %37 {offsets = [0, 384], sizes = [8, 128], strides = [1, 1]} : vector<8x512xf32> to vector<8x128xf32>
      %48 = math.tanh %47 : vector<8x128xf32>
      %49 = arith.mulf %45, %arg14 : vector<8x128xf32>
      %50 = arith.mulf %44, %48 : vector<8x128xf32>
      %51 = arith.addf %49, %50 : vector<8x128xf32>
      %52 = math.tanh %51 : vector<8x128xf32>
      %53 = arith.mulf %46, %52 : vector<8x128xf32>
      %54 = arith.truncf %53 : vector<8x128xf32> to vector<8x128xbf16>
      %55 = arith.index_cast %32 : i32 to index
      %c0_40 = arith.constant 0 : index
      %56 = vector.load %arg10[%55, %c0_40] : memref<64x128xbf16, #tpu.memory_space<vmem>>, vector<8x128xbf16>
      tpu.vector_store %arg10[%55, %c0_40], %54 {strides = array<i32>} : memref<64x128xbf16, #tpu.memory_space<vmem>>, vector<8x128xbf16>,
      scf.yield %53, %51 : vector<8x128xf32>, vector<8x128xf32>
    }
    %c8_i32_11 = arith.constant 8 : i32
    %c0_12 = arith.constant 0 : index
    %c0_13 = arith.constant 0 : index
    %12 = vector.load %arg4[%c0_12, %c0_13] : memref<128x512xbf16, #tpu.memory_space<vmem>>, vector<128x512xbf16>
    %c0_14 = arith.constant 0 : index
    %c0_15 = arith.constant 0 : index
    %13 = vector.load %arg5[%c0_14, %c0_15] : memref<128x512xbf16, #tpu.memory_space<vmem>>, vector<128x512xbf16>
    %c0_16 = arith.constant 0 : index
    %c0_17 = arith.constant 0 : index
    %14 = vector.load %arg6[%c0_16, %c0_17] : memref<1x512xf32, #tpu.memory_space<vmem>>, vector<1x512xf32>
    %c0_18 = arith.constant 0 : index
    %c0_19 = arith.constant 0 : index
    %15 = vector.load %arg10[%c0_18, %c0_19] : memref<64x128xbf16, #tpu.memory_space<vmem>>, vector<64x128xbf16>
    %cst_20 = arith.constant dense<0.000000e+00> : vector<64x512xf32>
    %16 = tpu.matmul %15, %12, %cst_20 {dimension_numbers = #tpu.dot_dimension_numbers<[1], [0], [0], [1], [0, 0, 1, 1], [], []>} : vector<64x128xbf16>, vector<128x512xbf16>, vector<64x512xf32> -> vector<64x512xf32>
    %17 = vector.broadcast %14 : vector<1x512xf32> to vector<64x512xf32>
    %18 = arith.addf %16, %17 : vector<64x512xf32>
    %c0_21 = arith.constant 0 : index
    %c0_22 = arith.constant 0 : index
    %19 = vector.load %arg11[%c0_21, %c0_22] : memref<64x512xf32, #tpu.memory_space<vmem>>, vector<64x512xf32>
    tpu.vector_store %arg11[%c0_21, %c0_22], %18 {strides = array<i32>} : memref<64x512xf32, #tpu.memory_space<vmem>>, vector<64x512xf32>,
    %cst_23 = arith.constant 0.000000e+00 : f32
    %20 = vector.broadcast %cst_23 : f32 to vector<8x128xf32>
    %cst_24 = arith.constant 0.000000e+00 : f32
    %21 = vector.broadcast %cst_24 : f32 to vector<8x128xf32>
    %c0_i32_25 = arith.constant 0 : i32
    %c8_i32_26 = arith.constant 8 : i32
    %22 = arith.addi %c0_i32_25, %c8_i32_26 : i32
    %c1_i32_27 = arith.constant 1 : i32
    %23:2 = scf.for %arg12 = %c0_i32_25 to %22 step %c1_i32_27 iter_args(%arg13 = %20, %arg14 = %21) -> (vector<8x128xf32>, vector<8x128xf32>)  : i32 {
      %c8_i32_36 = arith.constant 8 : i32
      %31 = arith.muli %arg12, %c8_i32_36 : i32
      %32 = tpu.assume_multiple %31, 8 : i32
      %33 = arith.index_cast %32 : i32 to index
      %c0_37 = arith.constant 0 : index
      %34 = vector.load %arg11[%33, %c0_37] : memref<64x512xf32, #tpu.memory_space<vmem>>, vector<8x512xf32>
      %35 = arith.truncf %arg13 : vector<8x128xf32> to vector<8x128xbf16>
      %cst_38 = arith.constant dense<0.000000e+00> : vector<8x512xf32>
      %36 = tpu.matmul %35, %13, %cst_38 {dimension_numbers = #tpu.dot_dimension_numbers<[1], [0], [0], [1], [0, 0, 1, 1], [], []>} : vector<8x128xbf16>, vector<128x512xbf16>, vector<8x512xf32> -> vector<8x512xf32>
      %37 = arith.addf %34, %36 : vector<8x512xf32>
      %38 = vector.extract_strided_slice %37 {offsets = [0, 0], sizes = [8, 384], strides = [1, 1]} : vector<8x512xf32> to vector<8x384xf32>
      %39 = arith.negf %38 : vector<8x384xf32>
      %40 = math.exp %39 : vector<8x384xf32>
      %cst_39 = arith.constant 1.000000e+00 : f32
      %41 = vector.broadcast %cst_39 : f32 to vector<8x384xf32>
      %42 = arith.addf %41, %40 : vector<8x384xf32>
      %43 = arith.divf %41, %42 : vector<8x384xf32>
      %44 = vector.extract_strided_slice %43 {offsets = [0, 0], sizes = [8, 128], strides = [1, 1]} : vector<8x384xf32> to vector<8x128xf32>
      %45 = vector.extract_strided_slice %43 {offsets = [0, 128], sizes = [8, 128], strides = [1, 1]} : vector<8x384xf32> to vector<8x128xf32>
      %46 = vector.extract_strided_slice %43 {offsets = [0, 256], sizes = [8, 128], strides = [1, 1]} : vector<8x384xf32> to vector<8x128xf32>
      %47 = vector.extract_strided_slice %37 {offsets = [0, 384], sizes = [8, 128], strides = [1, 1]} : vector<8x512xf32> to vector<8x128xf32>
      %48 = math.tanh %47 : vector<8x128xf32>
      %49 = arith.mulf %45, %arg14 : vector<8x128xf32>
      %50 = arith.mulf %44, %48 : vector<8x128xf32>
      %51 = arith.addf %49, %50 : vector<8x128xf32>
      %52 = math.tanh %51 : vector<8x128xf32>
      %53 = arith.mulf %46, %52 : vector<8x128xf32>
      scf.yield %53, %51 : vector<8x128xf32>, vector<8x128xf32>
    }
    %c8_i32_28 = arith.constant 8 : i32
    %24 = arith.truncf %23#0 : vector<8x128xf32> to vector<8x128xbf16>
    %c0_29 = arith.constant 0 : index
    %c0_30 = arith.constant 0 : index
    %25 = vector.load %arg7[%c0_29, %c0_30] : memref<128x128xbf16, #tpu.memory_space<vmem>>, vector<128x128xbf16>
    %cst_31 = arith.constant dense<0.000000e+00> : vector<8x128xf32>
    %26 = tpu.matmul %24, %25, %cst_31 {dimension_numbers = #tpu.dot_dimension_numbers<[1], [0], [0], [1], [0, 0, 1, 1], [], []>} : vector<8x128xbf16>, vector<128x128xbf16>, vector<8x128xf32> -> vector<8x128xf32>
    %c0_32 = arith.constant 0 : index
    %c0_33 = arith.constant 0 : index
    %27 = vector.load %arg8[%c0_32, %c0_33] : memref<1x128xf32, #tpu.memory_space<vmem>>, vector<1x128xf32>
    %28 = vector.broadcast %27 : vector<1x128xf32> to vector<8x128xf32>
    %29 = arith.addf %26, %28 : vector<8x128xf32>
    %c0_34 = arith.constant 0 : index
    %c0_35 = arith.constant 0 : index
    %30 = vector.load %arg9[%c0_34, %c0_35] : memref<8x128xf32, #tpu.memory_space<vmem>>, vector<8x128xf32>
    tpu.vector_store %arg9[%c0_34, %c0_35], %29 {strides = array<i32>} : memref<8x128xf32, #tpu.memory_space<vmem>>, vector<8x128xf32>,
    return
  }
}

</mosaic_0001>

<bundles_post_ra>
// kernel: lstm_model_forward.1
= control target key start
LH: loop header
LB: loop body
LE: loop exit
PB: predicated region body
PF: predicated region fallthrough
CT: control target
= control target key end

     0   :  { %14 = vsyncpa [#allocation5], 0  ;;  %s3027_s0 = inlined_call_operand.vmem [shape: bf16[64,4], index: 0, kind: input, shape index: {}]   ;;  %s3028_s1 = inlined_call_operand.hbm [shape: bf16[4,512], index: 1, kind: input, shape index: {}]   ;;  %s3029_s2 = inlined_call_operand.hbm [shape: bf16[128,512], index: 2, kind: input, shape index: {}]   ;;  %s3030_s3 = inlined_call_operand.vmem [shape: f32[1,512], index: 3, kind: input, shape index: {}]   ;;  %s3031_s4 = inlined_call_operand.hbm [shape: bf16[128,512], index: 4, kind: input, shape index: {}]   ;;  %s3032_s5 = inlined_call_operand.hbm [shape: bf16[128,512], index: 5, kind: input, shape index: {}]   ;;  %s3033_s6 = inlined_call_operand.hbm [shape: f32[1,512], index: 6, kind: input, shape index: {}]   ;;  %s3034_s7 = inlined_call_operand.vmem [shape: bf16[128,128], index: 7, kind: input, shape index: {}]   ;;  %s3035_s8 = inlined_call_operand.hbm [shape: f32[1,128], index: 8, kind: input, shape index: {}]   ;;  %s3036_s9 = inlined_call_operand.vmem [shape: f32[8,128], index: 9, kind: output, shape index: {}]  }
   0x1   :  { %15 = vsyncpa [#allocation7], 0 }
   0x2   :  { %16 = vsyncpa [#allocation10], 0  ;;  %s35_s11 = sshll.u32 %s3029_s2, 4  ;;  %s36_s11 = int_to_ptr.hbm [resolvable:$true] %s35_s11 }
   0x3   :  { %17 = vsyncpa [#allocation13], 0  ;;  %s2381_s12 = smov [#allocation6]   ;;  %s63_s16 = sshll.u32 %s3032_s5, 4  ;;  %s64_s16 = int_to_ptr.hbm [resolvable:$true] %s63_s16 }
   0x4   :  { %s37_s13 = sshll.u32 %s2381_s12, 4  ;;  %s2382_s17 = smov 256   ;;  %s38_s13 = int_to_ptr.vmem [resolvable:$true] %s37_s13 }
   0x5   :  { %s2383_s18 = smov 16   ;;  %s2384_s19 = smov [#allocation9]  }
   0x6   :  { %43 = dma.hbm_to_vmem [thread:$0]  %s36_s11, 4096, %s38_s13, [#allocation7], %s2382_s17, %s2382_s17, %s2383_s18  }
   0x7   :  { %s65_s20 = sshll.u32 %s2384_s19, 4  ;;  %s25_s23 = sshll.u32 %s3028_s1, 4  ;;  %s66_s20 = int_to_ptr.vmem [resolvable:$true] %s65_s20  ;;  %s26_s23 = int_to_ptr.hbm [resolvable:$true] %s25_s23 }
   0x8   :  { %71 = dma.hbm_to_vmem [thread:$0]  %s64_s16, 4096, %s66_s20, [#allocation10], %s2382_s17, %s2382_s17, %s2383_s18  }
   0x9   :  { %s50_s25 = sshll.u32 %s3031_s4, 4  ;;  %s2385_s26 = smov [#allocation4]   ;;  %s51_s25 = int_to_ptr.hbm [resolvable:$true] %s50_s25 }
   0xa   :  { %s27_s27 = sshll.u32 %s2385_s26, 4  ;;  %s2386_s5 = smov [#allocation8]   ;;  %s28_s27 = int_to_ptr.vmem [resolvable:$true] %s27_s27 }
   0xb   :  { %30 = dma.hbm_to_vmem [thread:$0]  %s26_s23, 128, %s28_s27, [#allocation5]  }
   0xc   :  { %s52_s28 = sshll.u32 %s2386_s5, 4  ;;  %s77_s10 = sshll.u32 %s3033_s6, 4  ;;  %s53_s28 = int_to_ptr.vmem [resolvable:$true] %s52_s28  ;;  %s78_s10 = int_to_ptr.hbm [resolvable:$true] %s77_s10 }
   0xd   :  { %58 = dma.hbm_to_vmem [thread:$0]  %s51_s25, 4096, %s53_s28, [#allocation7], %s2382_s17, %s2382_s17, %s2383_s18  }
   0xe   :  { %s90_s12 = sshll.u32 %s3035_s8, 4  ;;  %s2387_s13 = smov [#allocation11]   ;;  %s91_s12 = int_to_ptr.hbm [resolvable:$true] %s90_s12 }
   0xf   :  { %s79_s4 = sshll.u32 %s2387_s13, 4  ;;  %s2388_s14 = smov [#allocation12]   ;;  %s80_s4 = int_to_ptr.vmem [resolvable:$true] %s79_s4 }
  0x10   :  { %82 = dma.hbm_to_vmem [thread:$0]  %s78_s10, 64, %s80_s4, [#allocation10]  }
  0x11   :  { %s92_s15 = sshll.u32 %s2388_s14, 4  ;;  %s93_s15 = int_to_ptr.vmem [resolvable:$true] %s92_s15 }
  0x12   :  { %95 = dma.hbm_to_vmem [thread:$0]  %s91_s12, 16, %s93_s15, [#allocation13]  }
  0x13   :  { %2349 = dma.done.wait [#allocation5], 128  }
  0x14   :  { %2350 = vsyncadd [#allocation5], 4294967168 }
  0x15   :  { %2351 = dma.done.wait [#allocation7], 8192  }
  0x16   :  { %2352 = vsyncadd [#allocation7], 4294959104 }
  0x17   :  { %2353 = dma.done.wait [#allocation10], 4160  }
  0x18   :  { %2354 = vsyncadd [#allocation10], 4294963136 }
  0x19   :  { %2355 = dma.done.wait [#allocation13], 16  }
  0x1a   :  { %2356 = vsyncadd [#allocation13], 4294967280  ;;  %v2457_v0 = vld [vmem:[#allocation6 + $0x4] sm:$0xf]  ;;  %v2459_v1 = vld [vmem:[#allocation6] sm:$0xf] }
  0x1b   :  { %3037 = vst [vmem:[#allocation18_spill] sm:$0xff] %v2457_v0  ;;  %v2461_v2 = vld [vmem:[#allocation6 + $0xc] sm:$0xf]  ;;  %v2463_v3 = vld [vmem:[#allocation6 + $0x8] sm:$0xf]  ;;  %vm211_vm0 = vcmask 1041408  }
  0x1c   :  { %3038 = vst [vmem:[#allocation19_spill] sm:$0xff] %v2459_v1  ;;  %v2465_v4 = vld [vmem:[#allocation6 + $0x10] sm:$0xf0]  ;;  %v2467_v5 = vld [vmem:[#allocation6 + $0xc] sm:$0xf0]  ;;  %vm198_vm1 = vcmask 31744  }
  0x1d   :  { %3039 = vst [vmem:[#allocation20_spill] sm:$0xff] %v2461_v2  ;;  %v2469_v6 = vld [vmem:[#allocation6 + $0x18] sm:$0xf0]  ;;  %v2471_v7 = vld [vmem:[#allocation6 + $0x14] sm:$0xf0] }
  0x1e   :  { %3040 = vst [vmem:[#allocation21_spill] sm:$0xff] %v2463_v3  ;;  %v2473_v8 = vld [vmem:[#allocation6 + $0x24] sm:$0xf]  ;;  %v2475_v9 = vld [vmem:[#allocation6 + $0x20] sm:$0xf]  ;;  %v121_v2 = vld [vmem:[#allocation4] sm:$0xff] }
  0x1f   :  { %3041 = vst [vmem:[#allocation22_spill] sm:$0xff] %v2465_v4  ;;  %v2477_v10 = vld [vmem:[#allocation6 + $0x2c] sm:$0xf]  ;;  %v2479_v11 = vld [vmem:[#allocation6 + $0x28] sm:$0xf] }
  0x20   :  { %3042 = vst [vmem:[#allocation23_spill] sm:$0xff] %v2467_v5  ;;  %v2481_v12 = vld [vmem:[#allocation6 + $0x30] sm:$0xf0]  ;;  %v2483_v13 = vld [vmem:[#allocation6 + $0x2c] sm:$0xf0] }
  0x21   :  { %3043 = vst [vmem:[#allocation24_spill] sm:$0xff] %v2469_v6  ;;  %v2485_v14 = vld [vmem:[#allocation6 + $0x38] sm:$0xf0]  ;;  %v2487_v15 = vld [vmem:[#allocation6 + $0x34] sm:$0xf0]  ;;  %v2010_v5 = vld [vmem:[%s3027_s0] sm:$0xff] }
  0x22   :  { %3044 = vst [vmem:[#allocation25_spill] sm:$0xff] %v2471_v7  ;;  %v2489_v16 = vld [vmem:[#allocation6 + $0x44] sm:$0xf]  ;;  %v2491_v17 = vld [vmem:[#allocation6 + $0x40] sm:$0xf] }
  0x23   :  { %3045 = vst [vmem:[#allocation26_spill] sm:$0xff] %v2473_v8  ;;  %v2493_v18 = vld [vmem:[#allocation6 + $0x4c] sm:$0xf]  ;;  %v2495_v19 = vld [vmem:[#allocation6 + $0x48] sm:$0xf] }
  0x24   :  { %3046 = vst [vmem:[#allocation27_spill] sm:$0xff] %v2475_v9  ;;  %v2497_v20 = vld [vmem:[#allocation6 + $0x50] sm:$0xf0]  ;;  %v2499_v21 = vld [vmem:[#allocation6 + $0x4c] sm:$0xf0] }
  0x25   :  { %3047 = vst [vmem:[#allocation28_spill] sm:$0xff] %v2477_v10  ;;  %v2501_v22 = vld [vmem:[#allocation6 + $0x58] sm:$0xf0]  ;;  %v2503_v23 = vld [vmem:[#allocation6 + $0x54] sm:$0xf0] }
  0x26   :  { %3048 = vst [vmem:[#allocation29_spill] sm:$0xff] %v2479_v11  ;;  %v2505_v24 = vld [vmem:[#allocation6 + $0x64] sm:$0xf]  ;;  %v2507_v25 = vld [vmem:[#allocation6 + $0x60] sm:$0xf] }
  0x27   :  { %3049 = vst [vmem:[#allocation30_spill] sm:$0xff] %v2481_v12  ;;  %v2509_v26 = vld [vmem:[#allocation6 + $0x6c] sm:$0xf]  ;;  %v2511_v27 = vld [vmem:[#allocation6 + $0x68] sm:$0xf] }
  0x28   :  { %3050 = vst [vmem:[#allocation31_spill] sm:$0xff] %v2483_v13  ;;  %v2513_v28 = vld [vmem:[#allocation6 + $0x70] sm:$0xf0]  ;;  %v2515_v29 = vld [vmem:[#allocation6 + $0x6c] sm:$0xf0] }
  0x29   :  { %3051 = vst [vmem:[#allocation32_spill] sm:$0xff] %v2485_v14  ;;  %v2517_v30 = vld [vmem:[#allocation6 + $0x78] sm:$0xf0]  ;;  %v2519_v31 = vld [vmem:[#allocation6 + $0x74] sm:$0xf0] }
  0x2a   :  { %3052 = vst [vmem:[#allocation33_spill] sm:$0xff] %v2487_v15  ;;  %v2521_v32 = vld [vmem:[#allocation6 + $0x84] sm:$0xf]  ;;  %v2523_v33 = vld [vmem:[#allocation6 + $0x80] sm:$0xf] }
  0x2b   :  { %3053 = vst [vmem:[#allocation34_spill] sm:$0xff] %v2489_v16  ;;  %v2525_v34 = vld [vmem:[#allocation6 + $0x8c] sm:$0xf]  ;;  %v2527_v35 = vld [vmem:[#allocation6 + $0x88] sm:$0xf] }
  0x2c   :  { %3054 = vst [vmem:[#allocation35_spill] sm:$0xff] %v2491_v17  ;;  %v2529_v36 = vld [vmem:[#allocation6 + $0x90] sm:$0xf0]  ;;  %v2531_v37 = vld [vmem:[#allocation6 + $0x8c] sm:$0xf0] }
  0x2d   :  { %3055 = vst [vmem:[#allocation36_spill] sm:$0xff] %v2493_v18  ;;  %v2533_v38 = vld [vmem:[#allocation6 + $0x98] sm:$0xf0]  ;;  %v2535_v39 = vld [vmem:[#allocation6 + $0x94] sm:$0xf0] }
  0x2e   :  { %3056 = vst [vmem:[#allocation37_spill] sm:$0xff] %v2495_v19  ;;  %v2537_v40 = vld [vmem:[#allocation6 + $0xa4] sm:$0xf]  ;;  %v2539_v41 = vld [vmem:[#allocation6 + $0xa0] sm:$0xf] }
  0x2f   :  { %3057 = vst [vmem:[#allocation38_spill] sm:$0xff] %v2497_v20  ;;  %v2541_v42 = vld [vmem:[#allocation6 + $0xac] sm:$0xf]  ;;  %v2543_v43 = vld [vmem:[#allocation6 + $0xa8] sm:$0xf] }
  0x30   :  { %3058 = vst [vmem:[#allocation39_spill] sm:$0xff] %v2499_v21  ;;  %v2545_v44 = vld [vmem:[#allocation6 + $0xb0] sm:$0xf0]  ;;  %v2547_v45 = vld [vmem:[#allocation6 + $0xac] sm:$0xf0] }
  0x31   :  { %3059 = vst [vmem:[#allocation40_spill] sm:$0xff] %v2501_v22  ;;  %v2549_v46 = vld [vmem:[#allocation6 + $0xb8] sm:$0xf0]  ;;  %v2551_v47 = vld [vmem:[#allocation6 + $0xb4] sm:$0xf0] }
  0x32   :  { %3060 = vst [vmem:[#allocation41_spill] sm:$0xff] %v2503_v23  ;;  %v2553_v48 = vld [vmem:[#allocation6 + $0xc4] sm:$0xf]  ;;  %v2555_v49 = vld [vmem:[#allocation6 + $0xc0] sm:$0xf] }
  0x33   :  { %3061 = vst [vmem:[#allocation42_spill] sm:$0xff] %v2505_v24  ;;  %v2557_v50 = vld [vmem:[#allocation6 + $0xcc] sm:$0xf]  ;;  %v2559_v51 = vld [vmem:[#allocation6 + $0xc8] sm:$0xf] }
  0x34   :  { %3062 = vst [vmem:[#allocation43_spill] sm:$0xff] %v2507_v25  ;;  %v2561_v52 = vld [vmem:[#allocation6 + $0xd0] sm:$0xf0]  ;;  %v2563_v53 = vld [vmem:[#allocation6 + $0xcc] sm:$0xf0] }
  0x35   :  { %v2565_v54 = vld [vmem:[#allocation6 + $0xd8] sm:$0xf0]  ;;  %v2567_v55 = vld [vmem:[#allocation6 + $0xd4] sm:$0xf0]  ;;  %v2569_v56 = vld [vmem:[#allocation6 + $0xe4] sm:$0xf] }
  0x36   :  { %v2571_v57 = vld [vmem:[#allocation6 + $0xe0] sm:$0xf]  ;;  %v2573_v58 = vld [vmem:[#allocation6 + $0xec] sm:$0xf]  ;;  %v2575_v59 = vld [vmem:[#allocation6 + $0xe8] sm:$0xf] }
  0x37   :  { %v2577_v60 = vld [vmem:[#allocation6 + $0xf0] sm:$0xf0]  ;;  %v2579_v61 = vld [vmem:[#allocation6 + $0xec] sm:$0xf0]  ;;  %v2581_v62 = vld [vmem:[#allocation6 + $0xf8] sm:$0xf0] }
  0x38   :  { %v2583_v63 = vld [vmem:[#allocation6 + $0xf4] sm:$0xf0]  ;;  %193 = vst [vmem:[#allocation1] ss:$4 sm:$0xff] %v121_v2 }
  0x39   :  { %v2011_v2 = vld [vmem:[%s3027_s0 + $0x8] sm:$0xff] }
  0x3f   :  { %v194_v6 = vld.sshfl [vmem:[#allocation1] sm:$0xff pattern:$0x73625140]  ;;  %v195_v7 = vld.sshfl [vmem:[#allocation1 + $0x8] sm:$0xff pattern:$0x73625140] }
  0x40   :  { %v212_v3 = vsel %vm211_vm0, %v194_v6, 0  ;;  %v214_v0 = vsel %vm211_vm0, %v195_v7, 0  ;;  %v196_v4 = vld.sshfl [vmem:[#allocation1 + $0x10] sm:$0xff pattern:$0x73625140] }
  0x41   :  { %227 = vmatpush.bf16.msra.mxu0 %v212_v3  ;;  %256 = vmatpush.bf16.msra.mxu1 %v214_v0  ;;  %v216_v1 = vsel %vm211_vm0, %v196_v4, 0  ;;  %v197_v10 = vld.sshfl [vmem:[#allocation1 + $0x18] sm:$0xff pattern:$0x73625140]  ;;  %v2012_v0 = vld [vmem:[%s3027_s0 + $0x10] sm:$0xff] }
  0x42   :  { %285 = vmatpush.bf16.msra.mxu2 %v216_v1  ;;  %v218_v14 = vsel %vm211_vm0, %v197_v10, 0  ;;  %v2013_v1 = vld [vmem:[%s3027_s0 + $0x18] sm:$0xff]  ;;  %v154_v3 = vld [vmem:[%s3030_s3] sm:$0xf]  ;;  %s2660_s0 = smov 0  }
  0x43   :  { %314 = vmatpush.bf16.msra.mxu3 %v218_v14  ;;  %v2616_v4 = vperm.slane %v154_v3, 0 }
  0x44   :  { %1517 = vmatmul.msk.bf16.vlgmr.msra.gmra.mxu0 %vm198_vm1, %v2010_v5  ;;  %1521 = vmatmul.msk.bf16.vlgmr.msra.gmra.mxu1 %vm198_vm1, %v2010_v5 }
  0x45   :  { %1525 = vmatmul.msk.bf16.vlgmr.msra.gmra.mxu2 %vm198_vm1, %v2010_v5 }
  0x46   :  { %1529 = vmatmul.msk.bf16.vlgmr.msra.gmra.mxu3 %vm198_vm1, %v2010_v5  ;;  %v2618_v5 = vperm.slane %v154_v3, 1 }
  0x54   :  { %1518 = vmatmul.msk.bf16.gmra.mxu0 %vm198_vm1, %v2011_v2  ;;  %1522 = vmatmul.msk.bf16.gmra.mxu1 %vm198_vm1, %v2011_v2 }
  0x55   :  { %1526 = vmatmul.msk.bf16.gmra.mxu2 %vm198_vm1, %v2011_v2 }
  0x56   :  { %1530 = vmatmul.msk.bf16.gmra.mxu3 %vm198_vm1, %v2011_v2  ;;  %v2622_v2 = vperm.slane %v154_v3, 2 }
  0x64   :  { %1519 = vmatmul.msk.bf16.gmra.mxu0 %vm198_vm1, %v2012_v0  ;;  %1523 = vmatmul.msk.bf16.gmra.mxu1 %vm198_vm1, %v2012_v0 }
  0x65   :  { %1527 = vmatmul.msk.bf16.gmra.mxu2 %vm198_vm1, %v2012_v0 }
  0x66   :  { %1531 = vmatmul.msk.bf16.gmra.mxu3 %vm198_vm1, %v2012_v0  ;;  %v2624_v0 = vperm.slane %v154_v3, 3 }
  0x74   :  { %1520 = vmatmul.msk.bf16.gmra.mxu0 %vm198_vm1, %v2013_v1  ;;  %1524 = vmatmul.msk.bf16.gmra.mxu1 %vm198_vm1, %v2013_v1 }
  0x75   :  { %1528 = vmatmul.msk.bf16.gmra.mxu2 %vm198_vm1, %v2013_v1 }
  0x76   :  { %1532 = vmatmul.msk.bf16.gmra.mxu3 %vm198_vm1, %v2013_v1 }
  0xc1   :  { %v229_v6 = vpop.f32.mrf.mxu0  ;;  %v258_v7 = vpop.f32.mrf.mxu1 }
  0xc2   :  { %v230_v10 = vadd.f32 %v229_v6, %v2616_v4  ;;  %v259_v14 = vadd.f32 %v258_v7, %v2618_v5 }
  0xc4   :  { %336 = vst [vmem:[#allocation3] sm:$0xff] %v230_v10 }
  0xc5   :  { %337 = vst [vmem:[#allocation3 + $0x8] sm:$0xff] %v259_v14 }
  0xc8   :  { %v287_v1 = vpop.f32.mrf.mxu2 }
  0xc9   :  { %v288_v15 = vadd.f32 %v287_v1, %v2622_v2  ;;  %v316_v11 = vpop.f32.mrf.mxu3  ;;  %v231_v8 = vpop.f32.mrf.mxu0 }
  0xca   :  { %v317_v12 = vadd.f32 %v316_v11, %v2624_v0  ;;  %v232_v13 = vadd.f32 %v231_v8, %v2616_v4  ;;  %v260_v9 = vpop.f32.mrf.mxu1 }
  0xcb   :  { %338 = vst [vmem:[#allocation3 + $0x10] sm:$0xff] %v288_v15  ;;  %v261_v6 = vadd.f32 %v260_v9, %v2618_v5 }
  0xcc   :  { %339 = vst [vmem:[#allocation3 + $0x18] sm:$0xff] %v317_v12 }
  0xcd   :  { %340 = vst [vmem:[#allocation3 + $0x20] sm:$0xff] %v232_v13 }
  0xce   :  { %341 = vst [vmem:[#allocation3 + $0x28] sm:$0xff] %v261_v6 }
  0xd0   :  { %v289_v7 = vpop.f32.mrf.mxu2 }
  0xd1   :  { %v290_v3 = vadd.f32 %v289_v7, %v2622_v2  ;;  %v318_v10 = vpop.f32.mrf.mxu3  ;;  %v234_v14 = vpop.f32.mrf.mxu0 }
  0xd2   :  { %v319_v1 = vadd.f32 %v318_v10, %v2624_v0  ;;  %v235_v18 = vadd.f32 %v234_v14, %v2616_v4  ;;  %v263_v22 = vpop.f32.mrf.mxu1 }
  0xd3   :  { %342 = vst [vmem:[#allocation3 + $0x30] sm:$0xff] %v290_v3  ;;  %v264_v8 = vadd.f32 %v263_v22, %v2618_v5 }
  0xd4   :  { %343 = vst [vmem:[#allocation3 + $0x38] sm:$0xff] %v319_v1 }
  0xd5   :  { %344 = vst [vmem:[#allocation3 + $0x40] sm:$0xff] %v235_v18 }
  0xd6   :  { %345 = vst [vmem:[#allocation3 + $0x48] sm:$0xff] %v264_v8 }
  0xd8   :  { %v292_v9 = vpop.f32.mrf.mxu2 }
  0xd9   :  { %v293_v11 = vadd.f32 %v292_v9, %v2622_v2  ;;  %v321_v12 = vpop.f32.mrf.mxu3  ;;  %v236_v13 = vpop.f32.mrf.mxu0 }
  0xda   :  { %v322_v15 = vadd.f32 %v321_v12, %v2624_v0  ;;  %v237_v6 = vadd.f32 %v236_v13, %v2616_v4  ;;  %v265_v7 = vpop.f32.mrf.mxu1 }
  0xdb   :  { %346 = vst [vmem:[#allocation3 + $0x50] sm:$0xff] %v293_v11  ;;  %v266_v10 = vadd.f32 %v265_v7, %v2618_v5 }
  0xdc   :  { %347 = vst [vmem:[#allocation3 + $0x58] sm:$0xff] %v322_v15 }
  0xdd   :  { %348 = vst [vmem:[#allocation3 + $0x60] sm:$0xff] %v237_v6 }
  0xde   :  { %349 = vst [vmem:[#allocation3 + $0x68] sm:$0xff] %v266_v10 }
  0xe0   :  { %v294_v22 = vpop.f32.mrf.mxu2 }
  0xe1   :  { %v295_v18 = vadd.f32 %v294_v22, %v2622_v2  ;;  %v323_v3 = vpop.f32.mrf.mxu3  ;;  %v239_v14 = vpop.f32.mrf.mxu0 }
  0xe2   :  { %v324_v1 = vadd.f32 %v323_v3, %v2624_v0  ;;  %v240_v8 = vadd.f32 %v239_v14, %v2616_v4  ;;  %v268_v9 = vpop.f32.mrf.mxu1 }
  0xe3   :  { %350 = vst [vmem:[#allocation3 + $0x70] sm:$0xff] %v295_v18  ;;  %v269_v12 = vadd.f32 %v268_v9, %v2618_v5 }
  0xe4   :  { %351 = vst [vmem:[#allocation3 + $0x78] sm:$0xff] %v324_v1 }
  0xe5   :  { %352 = vst [vmem:[#allocation3 + $0x80] sm:$0xff] %v240_v8 }
  0xe6   :  { %353 = vst [vmem:[#allocation3 + $0x88] sm:$0xff] %v269_v12 }
  0xe8   :  { %v297_v11 = vpop.f32.mrf.mxu2 }
  0xe9   :  { %v298_v13 = vadd.f32 %v297_v11, %v2622_v2  ;;  %v326_v15 = vpop.f32.mrf.mxu3  ;;  %v241_v6 = vpop.f32.mrf.mxu0 }
  0xea   :  { %v327_v7 = vadd.f32 %v326_v15, %v2624_v0  ;;  %v242_v10 = vadd.f32 %v241_v6, %v2616_v4  ;;  %v270_v22 = vpop.f32.mrf.mxu1 }
  0xeb   :  { %354 = vst [vmem:[#allocation3 + $0x90] sm:$0xff] %v298_v13  ;;  %v271_v3 = vadd.f32 %v270_v22, %v2618_v5 }
  0xec   :  { %355 = vst [vmem:[#allocation3 + $0x98] sm:$0xff] %v327_v7 }
  0xed   :  { %356 = vst [vmem:[#allocation3 + $0xa0] sm:$0xff] %v242_v10 }
  0xee   :  { %357 = vst [vmem:[#allocation3 + $0xa8] sm:$0xff] %v271_v3 }
  0xf0   :  { %v299_v18 = vpop.f32.mrf.mxu2 }
  0xf1   :  { %v300_v14 = vadd.f32 %v299_v18, %v2622_v2  ;;  %v328_v1 = vpop.f32.mrf.mxu3  ;;  %v244_v8 = vpop.f32.mrf.mxu0 }
  0xf2   :  { %v329_v9 = vadd.f32 %v328_v1, %v2624_v0  ;;  %v245_v12 = vadd.f32 %v244_v8, %v2616_v4  ;;  %v273_v11 = vpop.f32.mrf.mxu1 }
  0xf3   :  { %358 = vst [vmem:[#allocation3 + $0xb0] sm:$0xff] %v300_v14  ;;  %v274_v15 = vadd.f32 %v273_v11, %v2618_v5  ;;  %v2656_v11 = vmov 0.0  }
  0xf4   :  { %359 = vst [vmem:[#allocation3 + $0xb8] sm:$0xff] %v329_v9 }
  0xf5   :  { %360 = vst [vmem:[#allocation3 + $0xc0] sm:$0xff] %v245_v12 }
  0xf6   :  { %361 = vst [vmem:[#allocation3 + $0xc8] sm:$0xff] %v274_v15  ;;  %v2658_v15 = vmov 0.0  }
  0xf8   :  { %v302_v13 = vpop.f32.mrf.mxu2 }
  0xf9   :  { %v303_v6 = vadd.f32 %v302_v13, %v2622_v2  ;;  %v331_v7 = vpop.f32.mrf.mxu3  ;;  %v246_v10 = vpop.f32.mrf.mxu0 }
  0xfa   :  { %v332_v22 = vadd.f32 %v331_v7, %v2624_v0  ;;  %v247_v3 = vadd.f32 %v246_v10, %v2616_v4  ;;  %v275_v18 = vpop.f32.mrf.mxu1 }
  0xfb   :  { %362 = vst [vmem:[#allocation3 + $0xd0] sm:$0xff] %v303_v6  ;;  %v276_v1 = vadd.f32 %v275_v18, %v2618_v5 }
  0xfc   :  { %363 = vst [vmem:[#allocation3 + $0xd8] sm:$0xff] %v332_v22 }
  0xfd   :  { %364 = vst [vmem:[#allocation3 + $0xe0] sm:$0xff] %v247_v3 }
  0xfe   :  { %365 = vst [vmem:[#allocation3 + $0xe8] sm:$0xff] %v276_v1 }
 0x100   :  { %v304_v14 = vpop.f32.mrf.mxu2 }
 0x101   :  { %v305_v8 = vadd.f32 %v304_v14, %v2622_v2  ;;  %v333_v9 = vpop.f32.mrf.mxu3 }
 0x102   :  { %v334_v12 = vadd.f32 %v333_v9, %v2624_v0 }
 0x103   :  { %366 = vst [vmem:[#allocation3 + $0xf0] sm:$0xff] %v305_v8 }
 0x104   :  { %367 = vst [vmem:[#allocation3 + $0xf8] sm:$0xff] %v334_v12 }
 0x105 LB: > { %v1651_v4 = vor.u32 %v2579_v61, %v2571_v57  ;;  %v1655_v5 = vor.u32 %v2569_v56, %v2577_v60  ;;  %v1659_v2 = vor.u32 %v2583_v63, %v2575_v59  ;;  %v1663_v0 = vor.u32 %v2573_v58, %v2581_v62  ;;  %v3063_v25 = vld [vmem:[#allocation43_spill] sm:$0xff]  ;;  %v3064_v24 = vld [vmem:[#allocation42_spill] sm:$0xff]  ;;  %v3069_v19 = vld [vmem:[#allocation37_spill] sm:$0xff]  ;;  %s1533_s3 = sshll.u32 %s2367_s0, 3  ;;  %s373_s0 = sadd.s32 1, %s2367_s0   ;;  %s2367_s0 = sphi %s2660_s0, %s373_s0   ;;  %v2363_v15 = vphi %v2658_v15, %v665_v15   ;;  %v2359_v11 = vphi %v2656_v11, %v663_v11  }
 0x106   : > { %v1635_v13 = vor.u32 %v2563_v53, %v2555_v49  ;;  %v1639_v6 = vor.u32 %v2553_v48, %v2561_v52  ;;  %v1643_v7 = vor.u32 %v2567_v55, %v2559_v51  ;;  %v1647_v10 = vor.u32 %v2557_v50, %v2565_v54  ;;  %v3065_v17 = vld [vmem:[#allocation35_spill] sm:$0xff]  ;;  %v3067_v20 = vld [vmem:[#allocation38_spill] sm:$0xff]  ;;  %v3070_v23 = vld [vmem:[#allocation41_spill] sm:$0xff]  ;;  %s2734_s2 = sshra.s32 %s1533_s3, 3  ;;  %p370_p0 = scmp.ge.s32.totalorder %s373_s0, 8  }
 0x107   : > { %547 = vmatpush.bf16.msra.mxu0 %v1651_v4  ;;  %560 = vmatpush.bf16.msra.mxu1 %v1655_v5  ;;  %v1619_v22 = vor.u32 %v2547_v45, %v2539_v41  ;;  %v1623_v3 = vor.u32 %v2537_v40, %v2545_v44  ;;  %v1627_v18 = vor.u32 %v2551_v47, %v2543_v43  ;;  %v3066_v21 = vld [vmem:[#allocation39_spill] sm:$0xff]  ;;  %v3068_v16 = vld [vmem:[#allocation34_spill] sm:$0xff]  ;;  %s2014_s24 = sshll.u32 %s2734_s2, 5  ;;  %s1667_s26 = sshll.u32 %s2734_s2, 2  ;;  %v2792_v40 = vld [vmem:[#allocation9 + $0x54] sm:$0xf0] (%p370_p0) }
 0x108   : > { %573 = vmatpush.bf16.msra.mxu2 %v1659_v2  ;;  %586 = vmatpush.bf16.msra.mxu3 %v1663_v0  ;;  %v1631_v1 = vor.u32 %v2541_v42, %v2549_v46  ;;  %v1603_v14 = vor.u32 %v2531_v37, %v2523_v33  ;;  %v1607_v8 = vor.u32 %v2521_v32, %v2529_v36  ;;  %s381_s25 = scalar_lea.vmem [#allocation3], %s2014_s24  ;;  %s668_s27 = scalar_lea.vmem [#allocation2], %s1667_s26  ;;  %v2776_v32 = vld [vmem:[#allocation9 + $0x34] sm:$0xf0] (%p370_p0)  ;;  %v2778_v33 = vld [vmem:[#allocation9 + $0x44] sm:$0xf] (%p370_p0) }
 0x109   : > { %v1611_v9 = vor.u32 %v2535_v39, %v2527_v35  ;;  %v1615_v12 = vor.u32 %v2525_v34, %v2533_v38  ;;  %v1587_v4 = vor.u32 %v2515_v29, %v3063_v25  ;;  %v1591_v5 = vor.u32 %v3064_v24, %v2513_v28  ;;  %v2768_v28 = vld [vmem:[#allocation9 + $0x28] sm:$0xf] (%p370_p0)  ;;  %v2770_v29 = vld [vmem:[#allocation9 + $0x30] sm:$0xf0] (%p370_p0)  ;;  %3105 = vst [vmem:[#allocation34_spill] sm:$0xff] (%p370_p0), %v2778_v33  ;;  %s2918_s5 = smov (%p370_p0), 0  }
 0x10a   : > { %v1595_v2 = vor.u32 %v2519_v31, %v2511_v27  ;;  %v1599_v0 = vor.u32 %v2509_v26, %v2517_v30  ;;  %v2764_v26 = vld [vmem:[#allocation9 + $0x20] sm:$0xf] (%p370_p0)  ;;  %v2766_v27 = vld [vmem:[#allocation9 + $0x2c] sm:$0xf] (%p370_p0)  ;;  %v2772_v30 = vld [vmem:[#allocation9 + $0x2c] sm:$0xf0] (%p370_p0) }
 0x10b   : > { %548 = vmatpush.bf16.msra.mxu0 %v1635_v13  ;;  %561 = vmatpush.bf16.msra.mxu1 %v1639_v6  ;;  %v1571_v13 = vor.u32 %v3066_v21, %v3065_v17  ;;  %v1575_v6 = vor.u32 %v3068_v16, %v3067_v20  ;;  %v3080_v17 = vld [vmem:[#allocation28_spill] sm:$0xff]  ;;  %v2780_v34 = vld [vmem:[#allocation9 + $0x40] sm:$0xf] (%p370_p0)  ;;  %v2782_v35 = vld [vmem:[#allocation9 + $0x4c] sm:$0xf] (%p370_p0)  ;;  %3112 = vst [vmem:[#allocation41_spill] sm:$0xff] (%p370_p0), %v2792_v40 }
 0x10c   : > { %574 = vmatpush.bf16.msra.mxu2 %v1643_v7  ;;  %587 = vmatpush.bf16.msra.mxu3 %v1647_v10  ;;  %v1579_v7 = vor.u32 %v3070_v23, %v3069_v19  ;;  %v3071_v10 = vld [vmem:[#allocation40_spill] sm:$0xff]  ;;  %3099 = vst [vmem:[#allocation28_spill] sm:$0xff] (%p370_p0), %v2766_v27  ;;  %v2784_v36 = vld [vmem:[#allocation9 + $0x48] sm:$0xf] (%p370_p0)  ;;  %v2788_v38 = vld [vmem:[#allocation9 + $0x4c] sm:$0xf0] (%p370_p0) }
 0x10d   :  { %v2774_v31 = vld [vmem:[#allocation9 + $0x38] sm:$0xf0] (%p370_p0)  ;;  %3106 = vst [vmem:[#allocation35_spill] sm:$0xff] (%p370_p0), %v2780_v34  ;;  %v2786_v37 = vld [vmem:[#allocation9 + $0x50] sm:$0xf0] (%p370_p0) }
 0x10e   :  { %3108 = vst [vmem:[#allocation37_spill] sm:$0xff] (%p370_p0), %v2784_v36  ;;  %v2790_v39 = vld [vmem:[#allocation9 + $0x58] sm:$0xf0] (%p370_p0)  ;;  %v2794_v41 = vld [vmem:[#allocation9 + $0x64] sm:$0xf] (%p370_p0) }
 0x10f   : > { %549 = vmatpush.bf16.msra.mxu0 %v1619_v22  ;;  %562 = vmatpush.bf16.msra.mxu1 %v1623_v3  ;;  %v3072_v22 = vld [vmem:[#allocation36_spill] sm:$0xff]  ;;  %3109 = vst [vmem:[#allocation38_spill] sm:$0xff] (%p370_p0), %v2786_v37  ;;  %v2796_v42 = vld [vmem:[#allocation9 + $0x60] sm:$0xf] (%p370_p0)  ;;  %v2798_v43 = vld [vmem:[#allocation9 + $0x6c] sm:$0xf] (%p370_p0) }
 0x110   : > { %575 = vmatpush.bf16.msra.mxu2 %v1627_v18  ;;  %588 = vmatpush.bf16.msra.mxu3 %v1631_v1  ;;  %v1583_v3 = vor.u32 %v3072_v22, %v3071_v10  ;;  %v3073_v18 = vld [vmem:[#allocation27_spill] sm:$0xff]  ;;  %v3084_v22 = vld [vmem:[#allocation18_spill] sm:$0xff]  ;;  %3107 = vst [vmem:[#allocation36_spill] sm:$0xff] (%p370_p0), %v2782_v35  ;;  %v2806_v47 = vld [vmem:[#allocation9 + $0x78] sm:$0xf0] (%p370_p0) }
 0x111   : > { %v3074_v1 = vld [vmem:[#allocation31_spill] sm:$0xff]  ;;  %3098 = vst [vmem:[#allocation27_spill] sm:$0xff] (%p370_p0), %v2764_v26  ;;  %v2800_v44 = vld [vmem:[#allocation9 + $0x68] sm:$0xf] (%p370_p0)  ;;  %v2808_v48 = vld [vmem:[#allocation9 + $0x74] sm:$0xf0] (%p370_p0) }
 0x112   : > { %v3082_v10 = vld [vmem:[#allocation23_spill] sm:$0xff]  ;;  %3102 = vst [vmem:[#allocation31_spill] sm:$0xff] (%p370_p0), %v2772_v30  ;;  %v2810_v49 = vld [vmem:[#allocation9 + $0x84] sm:$0xf] (%p370_p0)  ;;  %v2812_v50 = vld [vmem:[#allocation9 + $0x80] sm:$0xf] (%p370_p0) }
 0x113   : > { %550 = vmatpush.bf16.msra.mxu0 %v1603_v14  ;;  %563 = vmatpush.bf16.msra.mxu1 %v1607_v8  ;;  %v1555_v14 = vor.u32 %v3074_v1, %v3073_v18  ;;  %v3075_v8 = vld [vmem:[#allocation30_spill] sm:$0xff]  ;;  %v3085_v1 = vld [vmem:[#allocation21_spill] sm:$0xff]  ;;  %3110 = vst [vmem:[#allocation39_spill] sm:$0xff] (%p370_p0), %v2788_v38  ;;  %v2802_v45 = vld [vmem:[#allocation9 + $0x70] sm:$0xf0] (%p370_p0) }
 0x114   : > { %576 = vmatpush.bf16.msra.mxu2 %v1611_v9  ;;  %589 = vmatpush.bf16.msra.mxu3 %v1615_v12  ;;  %v3076_v9 = vld [vmem:[#allocation26_spill] sm:$0xff]  ;;  %3101 = vst [vmem:[#allocation30_spill] sm:$0xff] (%p370_p0), %v2770_v29  ;;  %v2804_v46 = vld [vmem:[#allocation9 + $0x6c] sm:$0xf0] (%p370_p0)  ;;  %v2818_v53 = vld [vmem:[#allocation9 + $0x90] sm:$0xf0] (%p370_p0) }
 0x115   : > { %v1559_v12 = vor.u32 %v3076_v9, %v3075_v8  ;;  %v3086_v8 = vld [vmem:[#allocation25_spill] sm:$0xff]  ;;  %v3087_v9 = vld [vmem:[#allocation24_spill] sm:$0xff]  ;;  %3111 = vst [vmem:[#allocation40_spill] sm:$0xff] (%p370_p0), %v2790_v39  ;;  %v2814_v51 = vld [vmem:[#allocation9 + $0x8c] sm:$0xf] (%p370_p0) }
 0x116   :  { %3113 = vst [vmem:[#allocation42_spill] sm:$0xff] (%p370_p0), %v2798_v43  ;;  %v2816_v52 = vld [vmem:[#allocation9 + $0x88] sm:$0xf] (%p370_p0)  ;;  %v2820_v54 = vld [vmem:[#allocation9 + $0x8c] sm:$0xf0] (%p370_p0) }
 0x117   : > { %551 = vmatpush.bf16.msra.mxu0 %v1587_v4  ;;  %564 = vmatpush.bf16.msra.mxu1 %v1591_v5  ;;  %v3077_v4 = vld [vmem:[#allocation29_spill] sm:$0xff]  ;;  %v2824_v56 = vld [vmem:[#allocation9 + $0x94] sm:$0xf0] (%p370_p0)  ;;  %v2830_v59 = vld [vmem:[#allocation9 + $0xac] sm:$0xf] (%p370_p0) }
 0x118   : > { %577 = vmatpush.bf16.msra.mxu2 %v1595_v2  ;;  %590 = vmatpush.bf16.msra.mxu3 %v1599_v0  ;;  %v3078_v5 = vld [vmem:[#allocation33_spill] sm:$0xff]  ;;  %v3079_v2 = vld [vmem:[#allocation32_spill] sm:$0xff]  ;;  %v3081_v0 = vld [vmem:[#allocation19_spill] sm:$0xff]  ;;  %3100 = vst [vmem:[#allocation29_spill] sm:$0xff] (%p370_p0), %v2768_v28 }
 0x119   : > { %v1563_v16 = vor.u32 %v3078_v5, %v3077_v4  ;;  %v1567_v19 = vor.u32 %v3080_v17, %v3079_v2  ;;  %v3088_v4 = vld [vmem:[#allocation20_spill] sm:$0xff]  ;;  %v386_v5 = vpack.c.bf16 %v2363_v15, %v2363_v15  ;;  %3103 = vst [vmem:[#allocation32_spill] sm:$0xff] (%p370_p0), %v2774_v31  ;;  %v2826_v57 = vld [vmem:[#allocation9 + $0xa4] sm:$0xf] (%p370_p0)  ;;  %v2828_v58 = vld [vmem:[#allocation9 + $0xa0] sm:$0xf] (%p370_p0) }
 0x11a   : > { %v383_v17 = vld [vmem:[%s381_s25 + $0x8] sm:$0xff]  ;;  %3104 = vst [vmem:[#allocation33_spill] sm:$0xff] (%p370_p0), %v2776_v32  ;;  %v2832_v60 = vld [vmem:[#allocation9 + $0xa8] sm:$0xf] (%p370_p0)  ;;  %v2834_v61 = vld [vmem:[#allocation9 + $0xb0] sm:$0xf0] (%p370_p0) }
 0x11b   : > { %552 = vmatpush.bf16.msra.mxu0 %v1571_v13  ;;  %565 = vmatpush.bf16.msra.mxu1 %v1575_v6  ;;  %v1539_v13 = vor.u32 %v3082_v10, %v3081_v0  ;;  %v3083_v6 = vld [vmem:[#allocation22_spill] sm:$0xff]  ;;  %v2822_v55 = vld [vmem:[#allocation9 + $0x98] sm:$0xf0] (%p370_p0)  ;;  %v2836_v62 = vld [vmem:[#allocation9 + $0xac] sm:$0xf0] (%p370_p0) }
 0x11c   : > { %578 = vmatpush.bf16.msra.mxu2 %v1579_v7  ;;  %591 = vmatpush.bf16.msra.mxu3 %v1583_v3  ;;  %v1543_v18 = vor.u32 %v3084_v22, %v3083_v6  ;;  %v1547_v7 = vor.u32 %v3086_v8, %v3085_v1  ;;  %v1551_v3 = vor.u32 %v3088_v4, %v3087_v9  ;;  %v384_v10 = vld [vmem:[%s381_s25 + $0x10] sm:$0xff]  ;;  %v2838_v63 = vld [vmem:[#allocation9 + $0xb8] sm:$0xf0] (%p370_p0)  ;;  %v2041_v32 = vld [vmem:[#allocation8 + $0xcc] sm:$0xf0] (%p370_p0) }
 0x11d   :  { %v1782_v31 = vld [vmem:[#allocation8 + $0xc0] sm:$0xf] (%p370_p0)  ;;  %v2039_v28 = vld [vmem:[#allocation8 + $0xc4] sm:$0xf] (%p370_p0)  ;;  %v1784_v29 = vld [vmem:[#allocation8 + $0xd0] sm:$0xf0] (%p370_p0) }
 0x11e   :  { %v1790_v30 = vld [vmem:[#allocation8 + $0xc8] sm:$0xf] (%p370_p0)  ;;  %v2042_v26 = vld [vmem:[#allocation8 + $0xd4] sm:$0xf0] (%p370_p0)  ;;  %v1787_v35 = vor.u32 (%p370_p0), %v2039_v28, %v1784_v29  ;;  %v2040_v40 = vld [vmem:[#allocation8 + $0xcc] sm:$0xf] (%p370_p0) }
 0x11f   : > { %553 = vmatpush.bf16.msra.mxu0 %v1555_v14  ;;  %566 = vmatpush.bf16.msra.mxu1 %v1559_v12  ;;  %v1791_v39 = vor.u32 (%p370_p0), %v2042_v26, %v1790_v30  ;;  %v1792_v36 = vld [vmem:[#allocation8 + $0xd8] sm:$0xf0] (%p370_p0)  ;;  %v2037_v33 = vld [vmem:[#allocation8 + $0xac] sm:$0xf0] (%p370_p0)  ;;  %v2038_v37 = vld [vmem:[#allocation8 + $0xb4] sm:$0xf0] (%p370_p0) }
 0x120   : > { %579 = vmatpush.bf16.msra.mxu2 %v1563_v16  ;;  %592 = vmatpush.bf16.msra.mxu3 %v1567_v19  ;;  %v382_v16 = vld [vmem:[%s381_s25] sm:$0xff]  ;;  %v1750_v38 = vld [vmem:[#allocation8 + $0x80] sm:$0xf] (%p370_p0)  ;;  %v2031_v28 = vld [vmem:[#allocation8 + $0x84] sm:$0xf] (%p370_p0) }
 0x121   :  { %v1752_v29 = vld [vmem:[#allocation8 + $0x90] sm:$0xf0] (%p370_p0)  ;;  %v2029_v34 = vld [vmem:[#allocation8 + $0x6c] sm:$0xf0] (%p370_p0) }
 0x123   : > { %554 = vmatpush.bf16.msra.mxu0 %v1539_v13  ;;  %567 = vmatpush.bf16.msra.mxu1 %v1543_v18 }
 0x124   : > { %580 = vmatpush.bf16.msra.mxu2 %v1547_v7  ;;  %593 = vmatpush.bf16.msra.mxu3 %v1551_v3 }
 0x126   : > { %555 = vmatmul.bf16.vlgmr.msra.gmra.mxu0 %v386_v5  ;;  %568 = vmatmul.bf16.vlgmr.msra.gmra.mxu1 %v386_v5 }
 0x127   : > { %581 = vmatmul.bf16.vlgmr.msra.gmra.mxu2 %v386_v5  ;;  %594 = vmatmul.bf16.vlgmr.msra.gmra.mxu3 %v386_v5  ;;  %v385_v5 = vld [vmem:[%s381_s25 + $0x18] sm:$0xff] }
 0x1a3   : > { %v556_v19 = vpop.f32.mrf.mxu0  ;;  %v569_v14 = vpop.f32.mrf.mxu1 }
 0x1a4   : > { %v599_v12 = vadd.f32 %v556_v19, %v382_v16  ;;  %v600_v15 = vadd.f32 %v569_v14, %v383_v17 }
 0x1a6   : > { %v1664_v2 = vmul.f32 -1.442695, %v599_v12  ;;  %v1665_v0 = vmul.f32 -1.442695, %v600_v15 }
 0x1a8   : > { %2148 = vpow2.f32 %v1664_v2 }
 0x1a9   : > { %2150 = vpow2.f32 %v1665_v0 }
 0x1aa   : > { %v582_v13 = vpop.f32.mrf.mxu2  ;;  %v595_v6 = vpop.f32.mrf.mxu3 }
 0x1ab   : > { %v601_v22 = vadd.f32 %v582_v13, %v384_v10  ;;  %v558_v18 = vpop.f32.mrf.mxu0  ;;  %v571_v1 = vpop.f32.mrf.mxu1  ;;  %v602_v14 = vadd.f32 %v595_v6, %v385_v5 }
 0x1ad   : > { %v1666_v8 = vmul.f32 -1.442695, %v601_v22 }
 0x1ae   : > { %v2149_v7 = vpop.eup %2148 }
 0x1af   : > { %v2151_v9 = vpop.eup %2150  ;;  %v612_v4 = vadd.f32 1.0, %v2149_v7  ;;  %2152 = vpow2.f32 %v1666_v8 }
 0x1b0   : > { %v613_v3 = vadd.f32 1.0, %v2151_v9 }
 0x1b1   : > { %2154 = vrcp.f32 %v612_v4  ;;  %v626_v18 = vand.u32 2147483648, %v612_v4  ;;  %v624_v7 = vand.u32 2147483647, %v612_v4  ;;  %vm620_vm4 = vweird.f32 %v612_v4 }
 0x1b2   : > { %2156 = vrcp.f32 %v613_v3  ;;  %v584_v16 = vpop.f32.mrf.mxu2  ;;  %v597_v17 = vpop.f32.mrf.mxu3  ;;  %v641_v1 = vand.u32 2147483648, %v613_v3  ;;  %vm635_vm5 = vweird.f32 %v613_v3 }
 0x1b3   : > { %v639_v16 = vand.u32 2147483647, %v613_v3  ;;  %vm625_vm8 = vcmp.eq.f32.partialorder %v624_v7, 8.507059e+37  ;;  %v2750_v7 = vld [vmem:[#allocation9 + $0xc] sm:$0xf] (%p370_p0) }
 0x1b4   :  { %3091 = vst [vmem:[#allocation20_spill] sm:$0xff] (%p370_p0), %v2750_v7  ;;  %v2043_v7 = vld [vmem:[#allocation8 + $0xe4] sm:$0xf] (%p370_p0) }
 0x1b5   : > { %v2153_v19 = vpop.eup %2152  ;;  %vm640_vm9 = vcmp.eq.f32.partialorder %v639_v16, 8.507059e+37 }
 0x1b6   : > { %v614_v12 = vadd.f32 1.0, %v2153_v19  ;;  %v627_v19 = vor.u32 1.1754944e-38, %v626_v18 }
 0x1b7   : > { %v2155_v15 = vpop.eup %2154 }
 0x1b8   : > { %v2157_v2 = vpop.eup %2156  ;;  %v616_v0 = vmul.f32 %v2155_v15, %v612_v4  ;;  %2158 = vrcp.f32 %v614_v12  ;;  %vm621_vm2 = vweird.f32 %v2155_v15  ;;  %vm650_vm11 = vweird.f32 %v614_v12 }
 0x1b9   : > { %v631_v10 = vmul.f32 %v2157_v2, %v613_v3  ;;  %2160 = vtanh.f32 %v602_v14  ;;  %vm636_vm3 = vweird.f32 %v2157_v2  ;;  %vm622_vm6 = vmor %vm620_vm4, %vm621_vm2  ;;  %v642_v14 = vor.u32 1.1754944e-38, %v641_v1  ;;  %v2748_v1 = vld [vmem:[#allocation9] sm:$0xf] (%p370_p0) }
 0x1ba   : > { %v617_v13 = vsub.f32 1.0, %v616_v0  ;;  %vm637_vm7 = vmor %vm635_vm5, %vm636_vm3  ;;  %v654_v18 = vand.u32 2147483647, %v614_v12  ;;  %3090 = vst [vmem:[#allocation19_spill] sm:$0xff] (%p370_p0), %v2748_v1 }
 0x1bb   : > { %v632_v22 = vsub.f32 1.0, %v631_v10 }
 0x1bc   : > { %v618_v8 = vmul.f32 %v2155_v15, %v617_v13  ;;  %vm655_vm13 = vcmp.eq.f32.partialorder %v654_v18, 8.507059e+37  ;;  %v2856_v18 = vld [vmem:[#allocation9 + $0xd4] sm:$0xf0] (%p370_p0) }
 0x1bd   : > { %v633_v9 = vmul.f32 %v2157_v2, %v632_v22 }
 0x1be   : > { %v2159_v17 = vpop.eup %2158  ;;  %v619_v20 = vadd.f32 %v2155_v15, %v618_v8  ;;  %v656_v8 = vand.u32 2147483648, %v614_v12 }
 0x1bf   : > { %v2161_v6 = vpop.eup %2160  ;;  %v646_v5 = vmul.f32 %v2159_v17, %v614_v12  ;;  %v634_v21 = vadd.f32 %v2157_v2, %v633_v9  ;;  %vm651_vm10 = vweird.f32 %v2159_v17  ;;  %v2746_v12 = vld [vmem:[#allocation9 + $0x4] sm:$0xf] (%p370_p0)  ;;  %v2752_v9 = vld [vmem:[#allocation9 + $0x8] sm:$0xf] (%p370_p0) }
 0x1c0   : > { %v623_v0 = vsel %vm622_vm6, %v2155_v15, %v619_v20  ;;  %vm652_vm12 = vmor %vm650_vm11, %vm651_vm10  ;;  %v657_v15 = vor.u32 1.1754944e-38, %v656_v8  ;;  %3089 = vst [vmem:[#allocation18_spill] sm:$0xff] (%p370_p0), %v2746_v12  ;;  %v2854_v8 = vld [vmem:[#allocation9 + $0xd8] sm:$0xf0] (%p370_p0)  ;;  %v2046_v12 = vld [vmem:[#allocation8 + $0xf4] sm:$0xf0] (%p370_p0) }
 0x1c1   : > { %v647_v10 = vsub.f32 1.0, %v646_v5  ;;  %v628_v13 = vsel %vm625_vm8, %v627_v19, %v623_v0  ;;  %v638_v23 = vsel %vm637_vm7, %v2157_v2, %v634_v21  ;;  %3092 = vst [vmem:[#allocation21_spill] sm:$0xff] (%p370_p0), %v2752_v9  ;;  %v2758_v5 = vld [vmem:[#allocation9 + $0x18] sm:$0xf0] (%p370_p0)  ;;  %v2760_v19 = vld [vmem:[#allocation9 + $0x14] sm:$0xf0] (%p370_p0) }
 0x1c2   : > { %v643_v22 = vsel %vm640_vm9, %v642_v14, %v638_v23  ;;  %v662_v24 = vmul.f32 %v2161_v6, %v628_v13  ;;  %v2756_v6 = vld [vmem:[#allocation9 + $0xc] sm:$0xf0] (%p370_p0)  ;;  %3095 = vst [vmem:[#allocation24_spill] sm:$0xff] (%p370_p0), %v2758_v5  ;;  %v2762_v14 = vld [vmem:[#allocation9 + $0x24] sm:$0xf] (%p370_p0) }
 0x1c3   : > { %v648_v25 = vmul.f32 %v2159_v17, %v647_v10  ;;  %v661_v4 = vmul.f32 %v2359_v11, %v643_v22  ;;  %3094 = vst [vmem:[#allocation23_spill] sm:$0xff] (%p370_p0), %v2756_v6  ;;  %v2842_v0 = vld [vmem:[#allocation9 + $0xc4] sm:$0xf] (%p370_p0)  ;;  %v2844_v10 = vld [vmem:[#allocation9 + $0xc0] sm:$0xf] (%p370_p0) }
 0x1c4   :  { %3096 = vst [vmem:[#allocation25_spill] sm:$0xff] (%p370_p0), %v2760_v19  ;;  %v2846_v13 = vld [vmem:[#allocation9 + $0xcc] sm:$0xf] (%p370_p0)  ;;  %v2848_v22 = vld [vmem:[#allocation9 + $0xc8] sm:$0xf] (%p370_p0) }
 0x1c5   : > { %v663_v11 = vadd.f32 %v662_v24, %v661_v4   ;;  %v649_v3 = vadd.f32 %v2159_v17, %v648_v25  ;;  %v1798_v24 = vld [vmem:[#allocation8 + $0xe0] sm:$0xf] (%p370_p0)  ;;  %v2045_v25 = vld [vmem:[#allocation8 + $0xec] sm:$0xf0] (%p370_p0)  ;;  %3097 = vst [vmem:[#allocation26_spill] sm:$0xff] (%p370_p0), %v2762_v14  ;;  %v1783_v14 = vor.u32 (%p370_p0), %v2041_v32, %v1782_v31 }
 0x1c6   :  { %v1799_v16 = vor.u32 (%p370_p0), %v2045_v25, %v1798_v24  ;;  %3114 = vst [vmem:[#allocation43_spill] sm:$0xff] (%p370_p0), %v2842_v0  ;;  %v2850_v4 = vld [vmem:[#allocation9 + $0xd0] sm:$0xf0] (%p370_p0)  ;;  %v2868_v24 = vld [vmem:[#allocation9 + $0xec] sm:$0xf0] (%p370_p0) }
 0x1c7   : > { %2162 = vtanh.f32 %v663_v11  ;;  %v653_v20 = vsel %vm652_vm12, %v2159_v17, %v649_v3  ;;  %v2754_v17 = vld [vmem:[#allocation9 + $0x10] sm:$0xf0] (%p370_p0)  ;;  %v2840_v11 = vld [vmem:[#allocation9 + $0xb4] sm:$0xf0] (%p370_p0)  ;;  %v2852_v3 = vld [vmem:[#allocation9 + $0xcc] sm:$0xf0] (%p370_p0) }
 0x1c8   : > { %v658_v2 = vsel %vm655_vm13, %v657_v15, %v653_v20  ;;  %3093 = vst [vmem:[#allocation22_spill] sm:$0xff] (%p370_p0), %v2754_v17  ;;  %936 = vmatpush.bf16.msra.mxu0 (%p370_p0), %v1799_v16  ;;  %v2858_v20 = vld [vmem:[#allocation9 + $0xe4] sm:$0xf] (%p370_p0)  ;;  %v2870_v25 = vld [vmem:[#allocation9 + $0xf8] sm:$0xf0] (%p370_p0) }
 0x1c9   :  { %v2872_v16 = vld [vmem:[#allocation9 + $0xf4] sm:$0xf0] (%p370_p0)  ;;  %v1800_v5 = vld [vmem:[#allocation8 + $0xf0] sm:$0xf0] (%p370_p0)  ;;  %v1806_v19 = vld [vmem:[#allocation8 + $0xe8] sm:$0xf] (%p370_p0) }
 0x1ca   :  { %v1803_v9 = vor.u32 (%p370_p0), %v2043_v7, %v1800_v5  ;;  %v2044_v17 = vld [vmem:[#allocation8 + $0xec] sm:$0xf] (%p370_p0)  ;;  %v1808_v6 = vld [vmem:[#allocation8 + $0xf8] sm:$0xf0] (%p370_p0)  ;;  %v1807_v1 = vor.u32 (%p370_p0), %v2046_v12, %v1806_v19  ;;  %v1766_v7 = vld [vmem:[#allocation8 + $0xa0] sm:$0xf] (%p370_p0)  ;;  %v1795_v5 = vor.u32 (%p370_p0), %v2040_v40, %v1792_v36 }
 0x1cb   :  { %v1811_v27 = vor.u32 (%p370_p0), %v2044_v17, %v1808_v6  ;;  %v2035_v12 = vld [vmem:[#allocation8 + $0xa4] sm:$0xf] (%p370_p0)  ;;  %v1768_v17 = vld [vmem:[#allocation8 + $0xb0] sm:$0xf0] (%p370_p0)  ;;  %v1767_v6 = vor.u32 (%p370_p0), %v2037_v33, %v1766_v7  ;;  %v1774_v19 = vld [vmem:[#allocation8 + $0xa8] sm:$0xf] (%p370_p0) }
 0x1cc   :  { %965 = vmatpush.bf16.msra.mxu1 (%p370_p0), %v1803_v9  ;;  %994 = vmatpush.bf16.msra.mxu2 (%p370_p0), %v1807_v1  ;;  %v2036_v9 = vld [vmem:[#allocation8 + $0xac] sm:$0xf] (%p370_p0)  ;;  %v1771_v31 = vor.u32 (%p370_p0), %v2035_v12, %v1768_v17  ;;  %v1776_v32 = vld [vmem:[#allocation8 + $0xb8] sm:$0xf0] (%p370_p0)  ;;  %v2033_v1 = vld [vmem:[#allocation8 + $0x8c] sm:$0xf0] (%p370_p0)  ;;  %v1775_v26 = vor.u32 (%p370_p0), %v2038_v37, %v1774_v19 }
 0x1cd   : > { %v2163_v21 = vpop.eup %2162  ;;  %1023 = vmatpush.bf16.msra.mxu3 (%p370_p0), %v1811_v27  ;;  %937 = vmatpush.bf16.msra.mxu0 (%p370_p0), %v1783_v14  ;;  %v1779_v27 = vor.u32 (%p370_p0), %v2036_v9, %v1776_v32  ;;  %v1758_v14 = vld [vmem:[#allocation8 + $0x88] sm:$0xf] (%p370_p0)  ;;  %v1751_v30 = vor.u32 (%p370_p0), %v2033_v1, %v1750_v38  ;;  %v2034_v36 = vld [vmem:[#allocation8 + $0x94] sm:$0xf0] (%p370_p0)  ;;  %v2032_v40 = vld [vmem:[#allocation8 + $0x8c] sm:$0xf] (%p370_p0) }
 0x1ce   : > { %v665_v15 = vmul.f32 %v2163_v21, %v658_v2   ;;  %372 = sbr.rel (!%p370_p0) target bundleno = 261 (0x105), region = 97  ;;  %v2862_v21 = vld [vmem:[#allocation9 + $0xec] sm:$0xf] (%p370_p0)  ;;  %v2864_v2 = vld [vmem:[#allocation9 + $0xe8] sm:$0xf] (%p370_p0)  ;;  %v1759_v12 = vor.u32 (%p370_p0), %v2034_v36, %v1758_v14 }
 0x1cf   :  { %v1760_v33 = vld [vmem:[#allocation8 + $0x98] sm:$0xf0] (%p370_p0)  ;;  %v1734_v7 = vld [vmem:[#allocation8 + $0x60] sm:$0xf] (%p370_p0)  ;;  %v1742_v37 = vld [vmem:[#allocation8 + $0x68] sm:$0xf] (%p370_p0) }
 0x1d0   : > { %v666_v23 = vpack.c.bf16 %v665_v15, %v665_v15  ;;  %v2860_v15 = vld [vmem:[#allocation9 + $0xe0] sm:$0xf] (%p370_p0)  ;;  %966 = vmatpush.bf16.msra.mxu1 (%p370_p0), %v1787_v35  ;;  %995 = vmatpush.bf16.msra.mxu2 (%p370_p0), %v1791_v39  ;;  %v1755_v35 = vor.u32 (%p370_p0), %v2031_v28, %v1752_v29  ;;  %v1763_v17 = vor.u32 (%p370_p0), %v2032_v40, %v1760_v33  ;;  %v2027_v39 = vld [vmem:[#allocation8 + $0x64] sm:$0xf] (%p370_p0)  ;;  %v2030_v9 = vld [vmem:[#allocation8 + $0x74] sm:$0xf0] (%p370_p0) }
 0x1d1   :  { %1024 = vmatpush.bf16.msra.mxu3 (%p370_p0), %v1795_v5  ;;  %938 = vmatpush.bf16.msra.mxu0 (%p370_p0), %v1767_v6  ;;  %v1736_v5 = vld [vmem:[#allocation8 + $0x70] sm:$0xf0] (%p370_p0)  ;;  %v1735_v19 = vor.u32 (%p370_p0), %v2029_v34, %v1734_v7  ;;  %v2028_v32 = vld [vmem:[#allocation8 + $0x6c] sm:$0xf] (%p370_p0)  ;;  %v1744_v6 = vld [vmem:[#allocation8 + $0x78] sm:$0xf0] (%p370_p0) }
 0x1d2   : > { %669 = vst [vmem:[%s668_s27] sm:$0xf] %v666_v23  ;;  %v2866_v23 = vld [vmem:[#allocation9 + $0xf0] sm:$0xf0] (%p370_p0)  ;;  %v1718_v38 = vld [vmem:[#allocation8 + $0x40] sm:$0xf] (%p370_p0)  ;;  %v1739_v43 = vor.u32 (%p370_p0), %v2027_v39, %v1736_v5  ;;  %v1747_v28 = vor.u32 (%p370_p0), %v2028_v32, %v1744_v6 }
 0x1d3   :  { %v2025_v1 = vld [vmem:[#allocation8 + $0x4c] sm:$0xf0]  ;;  %v1726_v29 = vld [vmem:[#allocation8 + $0x48] sm:$0xf]  ;;  %v2026_v36 = vld [vmem:[#allocation8 + $0x54] sm:$0xf0] }
 0x1d4   :  { %967 = vmatpush.bf16.msra.mxu1 %v1771_v31  ;;  %996 = vmatpush.bf16.msra.mxu2 %v1775_v26  ;;  %v1743_v31 = vor.u32 %v2030_v9, %v1742_v37  ;;  %v2023_v26 = vld [vmem:[#allocation8 + $0x44] sm:$0xf]  ;;  %v1719_v14 = vor.u32 %v2025_v1, %v1718_v38  ;;  %v2024_v40 = vld [vmem:[#allocation8 + $0x4c] sm:$0xf]  ;;  %v1702_v34 = vld [vmem:[#allocation8 + $0x20] sm:$0xf] }
 0x1d5   :  { %1025 = vmatpush.bf16.msra.mxu3 %v1779_v27  ;;  %939 = vmatpush.bf16.msra.mxu0 %v1751_v30  ;;  %v1720_v27 = vld [vmem:[#allocation8 + $0x50] sm:$0xf0]  ;;  %v1728_v30 = vld [vmem:[#allocation8 + $0x58] sm:$0xf0]  ;;  %v2021_v33 = vld [vmem:[#allocation8 + $0x2c] sm:$0xf0] }
 0x1d6   :  { %v1723_v7 = vor.u32 %v2023_v26, %v1720_v27  ;;  %v1731_v39 = vor.u32 %v2024_v40, %v1728_v30  ;;  %v1710_v5 = vld [vmem:[#allocation8 + $0x28] sm:$0xf]  ;;  %v1703_v37 = vor.u32 %v2021_v33, %v1702_v34  ;;  %v2022_v9 = vld [vmem:[#allocation8 + $0x34] sm:$0xf0]  ;;  %v2020_v32 = vld [vmem:[#allocation8 + $0x2c] sm:$0xf] }
 0x1d7   :  { %v1686_v6 = vld [vmem:[#allocation8] sm:$0xf]  ;;  %v2017_v38 = vld [vmem:[#allocation8 + $0xc] sm:$0xf0]  ;;  %v1694_v27 = vld [vmem:[#allocation8 + $0x8] sm:$0xf] }
 0x1d8   :  { %968 = vmatpush.bf16.msra.mxu1 %v1755_v35  ;;  %997 = vmatpush.bf16.msra.mxu2 %v1759_v12  ;;  %v1727_v35 = vor.u32 %v2026_v36, %v1726_v29  ;;  %v2019_v12 = vld [vmem:[#allocation8 + $0x24] sm:$0xf]  ;;  %v1687_v29 = vor.u32 %v2017_v38, %v1686_v6  ;;  %v2018_v36 = vld [vmem:[#allocation8 + $0x14] sm:$0xf0]  ;;  %v2016_v40 = vld [vmem:[#allocation8 + $0xc] sm:$0xf] }
 0x1d9   :  { %1026 = vmatpush.bf16.msra.mxu3 %v1763_v17  ;;  %940 = vmatpush.bf16.msra.mxu0 %v1735_v19  ;;  %v1704_v17 = vld [vmem:[#allocation8 + $0x30] sm:$0xf0]  ;;  %v1712_v19 = vld [vmem:[#allocation8 + $0x38] sm:$0xf0]  ;;  %v1695_v34 = vor.u32 %v2018_v36, %v1694_v27 }
 0x1da   :  { %v1707_v1 = vor.u32 %v2019_v12, %v1704_v17  ;;  %v1715_v26 = vor.u32 %v2020_v32, %v1712_v19  ;;  %v2082_v12 = vld [vmem:[#allocation2 + $0x18] sm:$0xff]  ;;  %v734_v17 = vld [vmem:[#allocation11] sm:$0xf] }
 0x1db   :  { %v2880_v38 = vperm.slane %v734_v17, 2 }
 0x1dc   :  { %969 = vmatpush.bf16.msra.mxu1 %v1739_v43  ;;  %998 = vmatpush.bf16.msra.mxu2 %v1743_v31  ;;  %v1711_v43 = vor.u32 %v2022_v9, %v1710_v5  ;;  %v2015_v31 = vld [vmem:[#allocation8 + $0x4] sm:$0xf]  ;;  %v2874_v5 = vperm.slane %v734_v17, 0 }
 0x1dd   :  { %1027 = vmatpush.bf16.msra.mxu3 %v1747_v28  ;;  %941 = vmatpush.bf16.msra.mxu0 %v1719_v14  ;;  %v1688_v28 = vld [vmem:[#allocation8 + $0x10] sm:$0xf0]  ;;  %v1696_v14 = vld [vmem:[#allocation8 + $0x18] sm:$0xf0] }
 0x1de   :  { %v1691_v30 = vor.u32 %v2015_v31, %v1688_v28  ;;  %v1699_v33 = vor.u32 %v2016_v40, %v1696_v14 }
 0x1e0   :  { %970 = vmatpush.bf16.msra.mxu1 %v1723_v7  ;;  %999 = vmatpush.bf16.msra.mxu2 %v1727_v35  ;;  %v2079_v7 = vld [vmem:[#allocation2] sm:$0xff]  ;;  %v2080_v35 = vld [vmem:[#allocation2 + $0x8] sm:$0xff] }
 0x1e1   :  { %1028 = vmatpush.bf16.msra.mxu3 %v1731_v39  ;;  %942 = vmatpush.bf16.msra.mxu0 %v1703_v37  ;;  %v2081_v39 = vld [vmem:[#allocation2 + $0x10] sm:$0xff]  ;;  %v2876_v37 = vperm.slane %v734_v17, 1 }
 0x1e4   :  { %971 = vmatpush.bf16.msra.mxu1 %v1707_v1  ;;  %1000 = vmatpush.bf16.msra.mxu2 %v1711_v43  ;;  %v2882_v1 = vperm.slane %v734_v17, 3 }
 0x1e5   :  { %1029 = vmatpush.bf16.msra.mxu3 %v1715_v26  ;;  %943 = vmatpush.bf16.msra.mxu0 %v1687_v29 }
 0x1e8   :  { %972 = vmatpush.bf16.msra.mxu1 %v1691_v30  ;;  %1001 = vmatpush.bf16.msra.mxu2 %v1695_v34 }
 0x1e9   :  { %1030 = vmatpush.bf16.msra.mxu3 %v1699_v33  ;;  %944 = vmatmul.bf16.vlgmr.msra.gmra.mxu0 %v2079_v7 }
 0x1eb   :  { %973 = vmatmul.bf16.vlgmr.msra.gmra.mxu1 %v2079_v7  ;;  %1002 = vmatmul.bf16.vlgmr.msra.gmra.mxu2 %v2079_v7 }
 0x1ec   :  { %1031 = vmatmul.bf16.vlgmr.msra.gmra.mxu3 %v2079_v7 }
 0x1f9   :  { %949 = vmatmul.bf16.gmra.mxu0 %v2080_v35 }
 0x1fb   :  { %978 = vmatmul.bf16.gmra.mxu1 %v2080_v35  ;;  %1007 = vmatmul.bf16.gmra.mxu2 %v2080_v35 }
 0x1fc   :  { %1036 = vmatmul.bf16.gmra.mxu3 %v2080_v35 }
 0x209   :  { %954 = vmatmul.bf16.gmra.mxu0 %v2081_v39 }
 0x20b   :  { %983 = vmatmul.bf16.gmra.mxu1 %v2081_v39  ;;  %1012 = vmatmul.bf16.gmra.mxu2 %v2081_v39 }
 0x20c   :  { %1041 = vmatmul.bf16.gmra.mxu3 %v2081_v39 }
 0x219   :  { %959 = vmatmul.bf16.gmra.mxu0 %v2082_v12 }
 0x21b   :  { %988 = vmatmul.bf16.gmra.mxu1 %v2082_v12  ;;  %1017 = vmatmul.bf16.gmra.mxu2 %v2082_v12 }
 0x21c   :  { %1046 = vmatmul.bf16.gmra.mxu3 %v2082_v12 }
 0x266   :  { %v945_v9 = vpop.f32.mrf.mxu0 }
 0x267   :  { %v946_v32 = vadd.f32 %v945_v9, %v2874_v5 }
 0x268   :  { %v974_v19 = vpop.f32.mrf.mxu1 }
 0x269   :  { %v975_v6 = vadd.f32 %v974_v19, %v2876_v37  ;;  %1052 = vst [vmem:[#allocation3] sm:$0xff] %v946_v32 }
 0x26b   :  { %1053 = vst [vmem:[#allocation3 + $0x8] sm:$0xff] %v975_v6 }
 0x26e   :  { %v1003_v43 = vpop.f32.mrf.mxu2  ;;  %v947_v27 = vpop.f32.mrf.mxu0 }
 0x26f   :  { %v1032_v26 = vpop.f32.mrf.mxu3  ;;  %v1004_v31 = vadd.f32 %v1003_v43, %v2880_v38  ;;  %v948_v36 = vadd.f32 %v947_v27, %v2874_v5 }
 0x270   :  { %v1033_v28 = vadd.f32 %v1032_v26, %v2882_v1  ;;  %v976_v29 = vpop.f32.mrf.mxu1 }
 0x271   :  { %v977_v40 = vadd.f32 %v976_v29, %v2876_v37  ;;  %1054 = vst [vmem:[#allocation3 + $0x10] sm:$0xff] %v1004_v31 }
 0x272   :  { %1055 = vst [vmem:[#allocation3 + $0x18] sm:$0xff] %v1033_v28 }
 0x273   :  { %1056 = vst [vmem:[#allocation3 + $0x20] sm:$0xff] %v948_v36 }
 0x274   :  { %1057 = vst [vmem:[#allocation3 + $0x28] sm:$0xff] %v977_v40 }
 0x276   :  { %v1005_v14 = vpop.f32.mrf.mxu2  ;;  %v950_v7 = vpop.f32.mrf.mxu0 }
 0x277   :  { %v1034_v30 = vpop.f32.mrf.mxu3  ;;  %v1006_v34 = vadd.f32 %v1005_v14, %v2880_v38  ;;  %v951_v39 = vadd.f32 %v950_v7, %v2874_v5 }
 0x278   :  { %v1035_v33 = vadd.f32 %v1034_v30, %v2882_v1  ;;  %v979_v35 = vpop.f32.mrf.mxu1 }
 0x279   :  { %v980_v12 = vadd.f32 %v979_v35, %v2876_v37  ;;  %1058 = vst [vmem:[#allocation3 + $0x30] sm:$0xff] %v1006_v34 }
 0x27a   :  { %1059 = vst [vmem:[#allocation3 + $0x38] sm:$0xff] %v1035_v33 }
 0x27b   :  { %1060 = vst [vmem:[#allocation3 + $0x40] sm:$0xff] %v951_v39 }
 0x27c   :  { %1061 = vst [vmem:[#allocation3 + $0x48] sm:$0xff] %v980_v12 }
 0x27e   :  { %v1008_v17 = vpop.f32.mrf.mxu2  ;;  %v952_v6 = vpop.f32.mrf.mxu0 }
 0x27f   :  { %v1037_v9 = vpop.f32.mrf.mxu3  ;;  %v1009_v32 = vadd.f32 %v1008_v17, %v2880_v38  ;;  %v953_v26 = vadd.f32 %v952_v6, %v2874_v5 }
 0x280   :  { %v1038_v19 = vadd.f32 %v1037_v9, %v2882_v1  ;;  %v981_v43 = vpop.f32.mrf.mxu1 }
 0x281   :  { %v982_v31 = vadd.f32 %v981_v43, %v2876_v37  ;;  %1062 = vst [vmem:[#allocation3 + $0x50] sm:$0xff] %v1009_v32 }
 0x282   :  { %1063 = vst [vmem:[#allocation3 + $0x58] sm:$0xff] %v1038_v19 }
 0x283   :  { %1064 = vst [vmem:[#allocation3 + $0x60] sm:$0xff] %v953_v26 }
 0x284   :  { %1065 = vst [vmem:[#allocation3 + $0x68] sm:$0xff] %v982_v31 }
 0x286   :  { %v1010_v28 = vpop.f32.mrf.mxu2  ;;  %v955_v40 = vpop.f32.mrf.mxu0 }
 0x287   :  { %v1039_v27 = vpop.f32.mrf.mxu3  ;;  %v1011_v29 = vadd.f32 %v1010_v28, %v2880_v38  ;;  %v956_v30 = vadd.f32 %v955_v40, %v2874_v5 }
 0x288   :  { %v1040_v36 = vadd.f32 %v1039_v27, %v2882_v1  ;;  %v984_v14 = vpop.f32.mrf.mxu1 }
 0x289   :  { %v985_v34 = vadd.f32 %v984_v14, %v2876_v37  ;;  %1066 = vst [vmem:[#allocation3 + $0x70] sm:$0xff] %v1011_v29 }
 0x28a   :  { %1067 = vst [vmem:[#allocation3 + $0x78] sm:$0xff] %v1040_v36 }
 0x28b   :  { %1068 = vst [vmem:[#allocation3 + $0x80] sm:$0xff] %v956_v30 }
 0x28c   :  { %1069 = vst [vmem:[#allocation3 + $0x88] sm:$0xff] %v985_v34 }
 0x28e   :  { %v1013_v33 = vpop.f32.mrf.mxu2  ;;  %v957_v12 = vpop.f32.mrf.mxu0 }
 0x28f   :  { %v1042_v7 = vpop.f32.mrf.mxu3  ;;  %v1014_v35 = vadd.f32 %v1013_v33, %v2880_v38  ;;  %v958_v9 = vadd.f32 %v957_v12, %v2874_v5 }
 0x290   :  { %v1043_v39 = vadd.f32 %v1042_v7, %v2882_v1  ;;  %v986_v17 = vpop.f32.mrf.mxu1 }
 0x291   :  { %v987_v32 = vadd.f32 %v986_v17, %v2876_v37  ;;  %1070 = vst [vmem:[#allocation3 + $0x90] sm:$0xff] %v1014_v35 }
 0x292   :  { %1071 = vst [vmem:[#allocation3 + $0x98] sm:$0xff] %v1043_v39 }
 0x293   :  { %1072 = vst [vmem:[#allocation3 + $0xa0] sm:$0xff] %v958_v9 }
 0x294   :  { %1073 = vst [vmem:[#allocation3 + $0xa8] sm:$0xff] %v987_v32  ;;  %v2914_v32 = vmov 0.0  }
 0x296   :  { %v1015_v19 = vpop.f32.mrf.mxu2  ;;  %v960_v31 = vpop.f32.mrf.mxu0 }
 0x297   :  { %v1044_v6 = vpop.f32.mrf.mxu3  ;;  %v1016_v43 = vadd.f32 %v1015_v19, %v2880_v38  ;;  %v961_v27 = vadd.f32 %v960_v31, %v2874_v5  ;;  %v2916_v19 = vmov 0.0  }
 0x298   :  { %v1045_v26 = vadd.f32 %v1044_v6, %v2882_v1  ;;  %v989_v28 = vpop.f32.mrf.mxu1 }
 0x299   :  { %v990_v29 = vadd.f32 %v989_v28, %v2876_v37  ;;  %1074 = vst [vmem:[#allocation3 + $0xb0] sm:$0xff] %v1016_v43 }
 0x29a   :  { %1075 = vst [vmem:[#allocation3 + $0xb8] sm:$0xff] %v1045_v26 }
 0x29b   :  { %1076 = vst [vmem:[#allocation3 + $0xc0] sm:$0xff] %v961_v27 }
 0x29c   :  { %1077 = vst [vmem:[#allocation3 + $0xc8] sm:$0xff] %v990_v29 }
 0x29e   :  { %v1018_v36 = vpop.f32.mrf.mxu2  ;;  %v962_v34 = vpop.f32.mrf.mxu0 }
 0x29f   :  { %v1047_v40 = vpop.f32.mrf.mxu3  ;;  %v1019_v14 = vadd.f32 %v1018_v36, %v2880_v38  ;;  %v963_v7 = vadd.f32 %v962_v34, %v2874_v5 }
 0x2a0   :  { %v1048_v30 = vadd.f32 %v1047_v40, %v2882_v1  ;;  %v991_v33 = vpop.f32.mrf.mxu1 }
 0x2a1   :  { %v992_v35 = vadd.f32 %v991_v33, %v2876_v37  ;;  %1078 = vst [vmem:[#allocation3 + $0xd0] sm:$0xff] %v1019_v14 }
 0x2a2   :  { %1079 = vst [vmem:[#allocation3 + $0xd8] sm:$0xff] %v1048_v30 }
 0x2a3   :  { %1080 = vst [vmem:[#allocation3 + $0xe0] sm:$0xff] %v963_v7 }
 0x2a4   :  { %1081 = vst [vmem:[#allocation3 + $0xe8] sm:$0xff] %v992_v35 }
 0x2a6   :  { %v1020_v39 = vpop.f32.mrf.mxu2 }
 0x2a7   :  { %v1049_v12 = vpop.f32.mrf.mxu3  ;;  %v1021_v17 = vadd.f32 %v1020_v39, %v2880_v38 }
 0x2a8   :  { %v1050_v9 = vadd.f32 %v1049_v12, %v2882_v1 }
 0x2a9   :  { %1082 = vst [vmem:[#allocation3 + $0xf0] sm:$0xff] %v1021_v17 }
 0x2aa   :  { %1083 = vst [vmem:[#allocation3 + $0xf8] sm:$0xff] %v1050_v9 }
 0x2ab LB: > { %v1930_v5 = vor.u32 %v2868_v24, %v2860_v15  ;;  %v1934_v37 = vor.u32 %v2858_v20, %v2866_v23  ;;  %v1938_v38 = vor.u32 %v2872_v16, %v2864_v2  ;;  %v1942_v1 = vor.u32 %v2862_v21, %v2870_v25  ;;  %v3115_v0 = vld [vmem:[#allocation43_spill] sm:$0xff]  ;;  %v3116_v39 = vld [vmem:[#allocation42_spill] sm:$0xff]  ;;  %s1812_s28 = sshll.u32 %s2379_s5, 3  ;;  %s1089_s5 = sadd.s32 1, %s2379_s5   ;;  %s2379_s5 = sphi %s2918_s5, %s1089_s5   ;;  %v2375_v19 = vphi %v2916_v19, %v3141_v19   ;;  %v2371_v32 = vphi %v2914_v32, %v1379_v32  }
 0x2ac   : > { %v1914_v6 = vor.u32 %v2852_v3, %v2844_v10  ;;  %v1918_v43 = vor.u32 %v3115_v0, %v2850_v4  ;;  %v1922_v26 = vor.u32 %v2856_v18, %v2848_v22  ;;  %v1926_v31 = vor.u32 %v2846_v13, %v2854_v8  ;;  %v3117_v17 = vld [vmem:[#allocation35_spill] sm:$0xff]  ;;  %s1093_s29 = sshra.s32 %s1812_s28, 3  ;;  %p1086_p1 = scmp.ge.s32.totalorder %s1089_s5, 8  }
 0x2ad   : > { %1263 = vmatpush.bf16.msra.mxu0 %v1930_v5  ;;  %1276 = vmatpush.bf16.msra.mxu1 %v1934_v37  ;;  %v1898_v28 = vor.u32 %v2836_v62, %v2828_v58  ;;  %v1902_v27 = vor.u32 %v2826_v57, %v2834_v61  ;;  %v1906_v29 = vor.u32 %v2840_v11, %v2832_v60  ;;  %v3118_v9 = vld [vmem:[#allocation39_spill] sm:$0xff]  ;;  %v3119_v37 = vld [vmem:[#allocation38_spill] sm:$0xff]  ;;  %s2083_s30 = sshll.u32 %s1093_s29, 5 }
 0x2ae   : > { %1289 = vmatpush.bf16.msra.mxu2 %v1938_v38  ;;  %1302 = vmatpush.bf16.msra.mxu3 %v1942_v1  ;;  %v1910_v36 = vor.u32 %v2830_v59, %v2838_v63  ;;  %v1882_v40 = vor.u32 %v2820_v54, %v2812_v50  ;;  %v1886_v14 = vor.u32 %v2810_v49, %v2818_v53  ;;  %v3120_v38 = vld [vmem:[#allocation34_spill] sm:$0xff]  ;;  %s1097_s10 = scalar_lea.vmem [#allocation3], %s2083_s30 }
 0x2af   : > { %v1890_v30 = vor.u32 %v2824_v56, %v2816_v52  ;;  %v1894_v34 = vor.u32 %v2814_v51, %v2822_v55  ;;  %v1866_v33 = vor.u32 %v2804_v46, %v2796_v42  ;;  %v1870_v7 = vor.u32 %v2794_v41, %v2802_v45  ;;  %v2087_v41 = vld [vmem:[%s3034_s7 + $0x18] sm:$0xff] (%p1086_p1)  ;;  %v2086_v42 = vld [vmem:[%s3034_s7 + $0x10] sm:$0xff] (%p1086_p1)  ;;  %v2084_v45 = vld [vmem:[%s3034_s7] sm:$0xff] (%p1086_p1) }
 0x2b0   : > { %v1874_v35 = vor.u32 %v2808_v48, %v2800_v44  ;;  %v1878_v12 = vor.u32 %v3116_v39, %v2806_v47  ;;  %v1850_v5 = vor.u32 %v3118_v9, %v3117_v17  ;;  %v1854_v1 = vor.u32 %v3120_v38, %v3119_v37  ;;  %v3132_v17 = vld [vmem:[#allocation28_spill] sm:$0xff]  ;;  %v3134_v37 = vld [vmem:[#allocation23_spill] sm:$0xff]  ;;  %v3135_v38 = vld [vmem:[#allocation22_spill] sm:$0xff] }
 0x2b1   : > { %1264 = vmatpush.bf16.msra.mxu0 %v1914_v6  ;;  %1277 = vmatpush.bf16.msra.mxu1 %v1918_v43  ;;  %v3121_v6 = vld [vmem:[#allocation37_spill] sm:$0xff] }
 0x2b2   : > { %1290 = vmatpush.bf16.msra.mxu2 %v1922_v26  ;;  %1303 = vmatpush.bf16.msra.mxu3 %v1926_v31  ;;  %v3122_v43 = vld [vmem:[#allocation41_spill] sm:$0xff]  ;;  %v3123_v31 = vld [vmem:[#allocation40_spill] sm:$0xff] }
 0x2b3   : > { %v1858_v26 = vor.u32 %v3122_v43, %v3121_v6  ;;  %v3137_v43 = vld [vmem:[#allocation21_spill] sm:$0xff] }
 0x2b4   :  { %v2085_v44 = vld [vmem:[%s3034_s7 + $0x8] sm:$0xff] (%p1086_p1)  ;;  %v2180_v47 = vld [vmem:[#allocation12] ss:$0 sm:$0xff] (%p1086_p1) }
 0x2b5   : > { %1265 = vmatpush.bf16.msra.mxu0 %v1898_v28  ;;  %1278 = vmatpush.bf16.msra.mxu1 %v1902_v27  ;;  %v3124_v28 = vld [vmem:[#allocation36_spill] sm:$0xff] }
 0x2b6   : > { %1291 = vmatpush.bf16.msra.mxu2 %v1906_v29  ;;  %1304 = vmatpush.bf16.msra.mxu3 %v1910_v36  ;;  %v1862_v27 = vor.u32 %v3124_v28, %v3123_v31  ;;  %v3125_v29 = vld [vmem:[#allocation27_spill] sm:$0xff]  ;;  %v3138_v31 = vld [vmem:[#allocation25_spill] sm:$0xff]  ;;  %v3139_v28 = vld [vmem:[#allocation24_spill] sm:$0xff] }
 0x2b7   : > { %v3126_v36 = vld [vmem:[#allocation31_spill] sm:$0xff] }
 0x2b9   : > { %1266 = vmatpush.bf16.msra.mxu0 %v1882_v40  ;;  %1279 = vmatpush.bf16.msra.mxu1 %v1886_v14  ;;  %v1834_v40 = vor.u32 %v3126_v36, %v3125_v29  ;;  %v3127_v14 = vld [vmem:[#allocation30_spill] sm:$0xff]  ;;  %v3140_v29 = vld [vmem:[#allocation20_spill] sm:$0xff]  ;;  %v1102_v36 = vpack.c.bf16 %v2375_v19, %v2375_v19 }
 0x2ba   : > { %1292 = vmatpush.bf16.msra.mxu2 %v1890_v30  ;;  %1305 = vmatpush.bf16.msra.mxu3 %v1894_v34  ;;  %v3128_v30 = vld [vmem:[#allocation26_spill] sm:$0xff] }
 0x2bb   : > { %v1838_v34 = vor.u32 %v3128_v30, %v3127_v14  ;;  %v1099_v14 = vld [vmem:[%s1097_s10 + $0x8] sm:$0xff] }
 0x2bd   : > { %1267 = vmatpush.bf16.msra.mxu0 %v1866_v33  ;;  %1280 = vmatpush.bf16.msra.mxu1 %v1870_v7  ;;  %v3129_v33 = vld [vmem:[#allocation29_spill] sm:$0xff] }
 0x2be   : > { %1293 = vmatpush.bf16.msra.mxu2 %v1874_v35  ;;  %1306 = vmatpush.bf16.msra.mxu3 %v1878_v12  ;;  %v3130_v7 = vld [vmem:[#allocation33_spill] sm:$0xff]  ;;  %v3131_v35 = vld [vmem:[#allocation32_spill] sm:$0xff]  ;;  %v3133_v12 = vld [vmem:[#allocation19_spill] sm:$0xff] }
 0x2bf   : > { %v1842_v39 = vor.u32 %v3130_v7, %v3129_v33  ;;  %v1846_v9 = vor.u32 %v3132_v17, %v3131_v35  ;;  %v1100_v35 = vld [vmem:[%s1097_s10 + $0x10] sm:$0xff] }
 0x2c1   : > { %1268 = vmatpush.bf16.msra.mxu0 %v1850_v5  ;;  %1281 = vmatpush.bf16.msra.mxu1 %v1854_v1  ;;  %v1818_v5 = vor.u32 %v3134_v37, %v3133_v12  ;;  %v3136_v1 = vld [vmem:[#allocation18_spill] sm:$0xff] }
 0x2c2   : > { %1294 = vmatpush.bf16.msra.mxu2 %v1858_v26  ;;  %1307 = vmatpush.bf16.msra.mxu3 %v1862_v27  ;;  %v1822_v6 = vor.u32 %v3136_v1, %v3135_v38  ;;  %v1826_v26 = vor.u32 %v3138_v31, %v3137_v43  ;;  %v1830_v27 = vor.u32 %v3140_v29, %v3139_v28 }
 0x2c5   : > { %1269 = vmatpush.bf16.msra.mxu0 %v1834_v40  ;;  %1282 = vmatpush.bf16.msra.mxu1 %v1838_v34  ;;  %v1098_v40 = vld [vmem:[%s1097_s10] sm:$0xff] }
 0x2c6   : > { %1295 = vmatpush.bf16.msra.mxu2 %v1842_v39  ;;  %1308 = vmatpush.bf16.msra.mxu3 %v1846_v9 }
 0x2c9   : > { %1270 = vmatpush.bf16.msra.mxu0 %v1818_v5  ;;  %1283 = vmatpush.bf16.msra.mxu1 %v1822_v6 }
 0x2ca   : > { %1296 = vmatpush.bf16.msra.mxu2 %v1826_v26  ;;  %1309 = vmatpush.bf16.msra.mxu3 %v1830_v27  ;;  %v1101_v26 = vld [vmem:[%s1097_s10 + $0x18] sm:$0xff] }
 0x2cc   : > { %1271 = vmatmul.bf16.vlgmr.msra.gmra.mxu0 %v1102_v36  ;;  %1284 = vmatmul.bf16.vlgmr.msra.gmra.mxu1 %v1102_v36 }
 0x2cd   : > { %1297 = vmatmul.bf16.vlgmr.msra.gmra.mxu2 %v1102_v36  ;;  %1310 = vmatmul.bf16.vlgmr.msra.gmra.mxu3 %v1102_v36 }
 0x349   : > { %v1272_v30 = vpop.f32.mrf.mxu0  ;;  %v1285_v34 = vpop.f32.mrf.mxu1 }
 0x34a   : > { %v1315_v33 = vadd.f32 %v1272_v30, %v1098_v40  ;;  %v1316_v7 = vadd.f32 %v1285_v34, %v1099_v14 }
 0x34c   : > { %v1943_v39 = vmul.f32 -1.442695, %v1315_v33  ;;  %v1944_v19 = vmul.f32 -1.442695, %v1316_v7 }
 0x34e   : > { %2164 = vpow2.f32 %v1943_v39 }
 0x34f   : > { %2166 = vpow2.f32 %v1944_v19 }
 0x350   : > { %v1298_v17 = vpop.f32.mrf.mxu2  ;;  %v1311_v9 = vpop.f32.mrf.mxu3 }
 0x351   : > { %v1317_v12 = vadd.f32 %v1298_v17, %v1100_v35  ;;  %v1274_v37 = vpop.f32.mrf.mxu0  ;;  %v1287_v5 = vpop.f32.mrf.mxu1  ;;  %v1318_v36 = vadd.f32 %v1311_v9, %v1101_v26 }
 0x353   : > { %v1945_v38 = vmul.f32 -1.442695, %v1317_v12 }
 0x354   : > { %v2165_v1 = vpop.eup %2164 }
 0x355   : > { %v2167_v6 = vpop.eup %2166  ;;  %v1328_v43 = vadd.f32 1.0, %v2165_v1  ;;  %2168 = vpow2.f32 %v1945_v38 }
 0x356   : > { %v1329_v31 = vadd.f32 1.0, %v2167_v6 }
 0x357   : > { %2170 = vrcp.f32 %v1328_v43  ;;  %v1342_v19 = vand.u32 2147483648, %v1328_v43  ;;  %v1340_v12 = vand.u32 2147483647, %v1328_v43  ;;  %vm1336_vm0 = vweird.f32 %v1328_v43 }
 0x358   : > { %2172 = vrcp.f32 %v1329_v31  ;;  %v1300_v28 = vpop.f32.mrf.mxu2  ;;  %v1313_v29 = vpop.f32.mrf.mxu3  ;;  %v1357_v35 = vand.u32 2147483648, %v1329_v31  ;;  %v1355_v5 = vand.u32 2147483647, %v1329_v31  ;;  %vm1351_vm1 = vweird.f32 %v1329_v31 }
 0x359   : > { %v1343_v26 = vor.u32 1.1754944e-38, %v1342_v19  ;;  %vm1341_vm4 = vcmp.eq.f32.partialorder %v1340_v12, 8.507059e+37 }
 0x35a   : > { %v1358_v29 = vor.u32 1.1754944e-38, %v1357_v35  ;;  %vm1356_vm5 = vcmp.eq.f32.partialorder %v1355_v5, 8.507059e+37  ;;  %v2089_v5 = vld [vmem:[%s3034_s7 + $0x28] sm:$0xff] (%p1086_p1) }
 0x35b   : > { %v2169_v27 = vpop.eup %2168 }
 0x35c   : > { %v1330_v40 = vadd.f32 1.0, %v2169_v27 }
 0x35d   : > { %v2171_v14 = vpop.eup %2170 }
 0x35e   : > { %v2173_v30 = vpop.eup %2172  ;;  %v1332_v34 = vmul.f32 %v2171_v14, %v1328_v43  ;;  %2174 = vrcp.f32 %v1330_v40  ;;  %vm1337_vm14 = vweird.f32 %v2171_v14  ;;  %vm1366_vm7 = vweird.f32 %v1330_v40 }
 0x35f   : > { %v1347_v33 = vmul.f32 %v2173_v30, %v1329_v31  ;;  %2176 = vtanh.f32 %v1318_v36  ;;  %vm1352_vm15 = vweird.f32 %v2173_v30  ;;  %vm1338_vm2 = vmor %vm1336_vm0, %vm1337_vm14  ;;  %v1372_v31 = vand.u32 2147483648, %v1330_v40 }
 0x360   : > { %v1333_v7 = vsub.f32 1.0, %v1332_v34  ;;  %vm1353_vm3 = vmor %vm1351_vm1, %vm1352_vm15  ;;  %v1370_v19 = vand.u32 2147483647, %v1330_v40 }
 0x361   : > { %v1348_v39 = vsub.f32 1.0, %v1347_v33 }
 0x362   : > { %v1334_v17 = vmul.f32 %v2171_v14, %v1333_v7  ;;  %vm1371_vm9 = vcmp.eq.f32.partialorder %v1370_v19, 8.507059e+37 }
 0x363   : > { %v1349_v37 = vmul.f32 %v2173_v30, %v1348_v39 }
 0x364   : > { %v2175_v38 = vpop.eup %2174  ;;  %v1335_v1 = vadd.f32 %v2171_v14, %v1334_v17 }
 0x365   : > { %v2177_v9 = vpop.eup %2176  ;;  %v1362_v6 = vmul.f32 %v2175_v38, %v1330_v40  ;;  %v1350_v28 = vadd.f32 %v2173_v30, %v1349_v37  ;;  %vm1367_vm6 = vweird.f32 %v2175_v38  ;;  %v2090_v40 = vld [vmem:[%s3034_s7 + $0x30] sm:$0xff] (%p1086_p1) }
 0x366   : > { %v1339_v27 = vsel %vm1338_vm2, %v2171_v14, %v1335_v1  ;;  %vm1368_vm8 = vmor %vm1366_vm7, %vm1367_vm6  ;;  %v1373_v14 = vor.u32 1.1754944e-38, %v1372_v31 }
 0x367   : > { %v1363_v36 = vsub.f32 1.0, %v1362_v6  ;;  %v1344_v34 = vsel %vm1341_vm4, %v1343_v26, %v1339_v27  ;;  %v1354_v33 = vsel %vm1353_vm3, %v2173_v30, %v1350_v28 }
 0x368   : > { %v1359_v7 = vsel %vm1356_vm5, %v1358_v29, %v1354_v33  ;;  %v1378_v39 = vmul.f32 %v2177_v9, %v1344_v34 }
 0x369   : > { %v1364_v0 = vmul.f32 %v2175_v38, %v1363_v36  ;;  %v1377_v17 = vmul.f32 %v2371_v32, %v1359_v7 }
 0x36b   : > { %v1379_v32 = vadd.f32 %v1378_v39, %v1377_v17   ;;  %v1365_v43 = vadd.f32 %v2175_v38, %v1364_v0  ;;  %v2091_v0 = vld [vmem:[%s3034_s7 + $0x38] sm:$0xff] (%p1086_p1) }
 0x36c   :  { %1451 = vmatpush.bf16.msra.mxu0 (%p1086_p1), %v2091_v0 }
 0x36d   : > { %2178 = vtanh.f32 %v1379_v32  ;;  %v1369_v35 = vsel %vm1368_vm8, %v2175_v38, %v1365_v43  ;;  %v2088_v38 = vld [vmem:[%s3034_s7 + $0x20] sm:$0xff] (%p1086_p1) }
 0x36e   : > { %v1374_v37 = vsel %vm1371_vm9, %v1373_v14, %v1369_v35 }
 0x370   :  { %1452 = vmatpush.bf16.msra.mxu0 (%p1086_p1), %v2090_v40 }
 0x372   :  { %1088 = sbr.rel (!%p1086_p1) target bundleno = 683 (0x2ab), region = 108 }
 0x373   : > { %v2179_v12 = vpop.eup %2178 }
 0x374   : > { %v1381_v30 = vmul.f32 %v2179_v12, %v1374_v37   ;;  %1453 = vmatpush.bf16.msra.mxu0 (%p1086_p1), %v2089_v5 }
 0x376   : > { %v3141_v19 = vmov %v1381_v30  ;;  %v1382_v46 = vpack.c.bf16 (%p1086_p1), %v1381_v30, %v1381_v30 }
 0x378   :  { %1454 = vmatpush.bf16.msra.mxu0 %v2088_v38 }
 0x37c   :  { %1455 = vmatpush.bf16.msra.mxu0 %v2087_v41 }
 0x380   :  { %1456 = vmatpush.bf16.msra.mxu0 %v2086_v42 }
 0x384   :  { %1457 = vmatpush.bf16.msra.mxu0 %v2085_v44 }
 0x388   :  { %1458 = vmatpush.bf16.msra.mxu0 %v2084_v45 }
 0x38b   :  { %1459 = vmatmul.bf16.vlgmr.msra.gmra.mxu0 %v1382_v46 }
 0x408   :  { %v1460_v48 = vpop.f32.mrf.mxu0 }
 0x409   :  { %v1461_v49 = vadd.f32 %v2180_v47, %v1460_v48 }
 0x40b   :  { %1464 = vst [vmem:[%s3036_s9] sm:$0xff] %v1461_v49 }
 0x410   :  { %v1462_v50 = vpop.f32.mrf.mxu0 }
 0x411   :  { %1469 = vsyncpa [#allocation5], 1 }
 0x412   :  { %1470 = vsyncpa [#allocation7], 1 }
 0x413   :  { %1471 = vsyncpa [#allocation10], 1 }
 0x414   :  { %1472 = vsyncpa [#allocation13], 1 }

</bundles_post_ra>
